<compile_context>
chip_gen: v6e
topology: v6e:2x2x1
jax: 0.10.0
libtpu: 0.0.40
codegen_flags: <defaults>
</compile_context>

<pallas_src>
import jax
import jax.numpy as jnp
from jax import lax
from jax.experimental import pallas as pl
from jax.experimental.pallas import tpu as pltpu

OUT_LANES = 128  # lane-dense output width (one full vreg of lanes)


def lstm_model_kernel(x_ref, w1r_ref, b1_ref,
                      wih0t_ref, whh0t_ref, b0_ref,
                      wih1t_ref, whh1t_ref, bl1_ref,
                      w2a_ref, w2b_ref, b2_ref,
                      out_ref, g0_ref):
    T, B, _ = x_ref.shape                 # (T, TB, 1) block
    H = w1r_ref.shape[1]
    G = 4 * H
    cdt = whh0t_ref.dtype                 # MXU operand dtype (f32 or bf16)

    # ---- linear_1 + ReLU (K == 1 -> VPU broadcast multiply, no MXU) --------
    x = x_ref[...].reshape(T * B, 1)                               # (T*B, 1)
    z = jnp.maximum(x * w1r_ref[...] + b1_ref[...], 0.0)           # (T*B, H)

    # ---- layer-0 input projection for ALL timesteps in one batched matmul --
    g0_all = jnp.dot(z.astype(cdt), wih0t_ref[...],
                     preferred_element_type=jnp.float32) + b0_ref[...]
    g0_ref[...] = g0_all.reshape(T, B, G)

    # Loop-invariant operands hoisted out of the recurrence.
    whh0t = whh0t_ref[...]                                         # (H, 4H)
    whh1t = whh1t_ref[...]                                         # (H, 4H)
    wih1t = wih1t_ref[...]                                         # (H, 4H)
    bl1_b = jnp.broadcast_to(bl1_ref[...], (B, G))                 # (B, 4H)
    # Lane mask selecting the tanh ('g') gate lanes; hoisted (no per-iter
    # broadcast_in_dim inside the unrolled loop).
    lane = lax.broadcasted_iota(jnp.int32, (B, G), 1)
    is_g_lane = (lane >= 2 * H) & (lane < 3 * H)

    def gates_to_hc(gates, c_full):
        # gates: (B, 4H) pre-activation, PyTorch lane order [ i | f | g | o ].
        # Full-vreg masked activation (EUP) + XLU rolls to align the
        # cross-gate products -- no 32-lane extracts at non-zero offsets.
        act = jnp.where(is_g_lane, jnp.tanh(gates), jax.nn.sigmoid(gates))
        f_al = pltpu.roll(act, shift=3 * H, axis=1)   # lanes [0:H] = sig(f)
        g_al = pltpu.roll(act, shift=2 * H, axis=1)   # lanes [0:H] = tanh(g)
        o_al = pltpu.roll(act, shift=1 * H, axis=1)   # lanes [0:H] = sig(o)
        c_new = f_al * c_full + act * g_al            # lanes [0:H] valid
        h_new = o_al * jnp.tanh(c_new)                # lanes [0:H] valid
        return h_new[:, :H], c_new                    # offset-0 narrow slice

    def step(t, carry):
        h0, c0, h1, c1 = carry
        # Both recurrent matmuls depend only on the carries: issue them first
        # so they pipeline in the MXU while the gate math runs.
        rec0 = jnp.dot(h0.astype(cdt), whh0t,
                       preferred_element_type=jnp.float32)
        rec1 = jnp.dot(h1.astype(cdt), whh1t,
                       preferred_element_type=jnp.float32) + bl1_b
        # Layer 0: input projection precomputed; add only the recurrent term.
        h0, c0 = gates_to_hc(g0_ref[t] + rec0, c0)
        # Layer 1: only the small dependent matmul (K=H) after layer 0.
        g1 = jnp.dot(h0.astype(cdt), wih1t,
                     preferred_element_type=jnp.float32) + rec1
        h1, c1 = gates_to_hc(g1, c1)
        return h0, c0, h1, c1

    hz = jnp.zeros((B, H), jnp.float32)
    cz = jnp.zeros((B, G), jnp.float32)
    # Cap the unroll: full unroll only for small tiles / short sequences so
    # live ranges stay inside the 64-vreg file; partial unroll otherwise.
    unroll = T if (B <= 64 and T <= 32) else min(4, T)
    h0, c0, h1, c1 = lax.fori_loop(0, T, step, (hz, cz, hz, cz),
                                   unroll=unroll)

    # h_n.permute(1,0,2).reshape(B, 2H) @ w2.T + b2  (output_size == 1)
    # -> per-row dot with the two halves of w2: VPU multiply + lane reduce.
    feat = h0 * w2a_ref[...] + h1 * w2b_ref[...]                   # (B, H)
    pred = jnp.sum(feat, axis=-1, keepdims=True) + b2_ref[...]     # (B, 1)
    # Lane-dense store: broadcast along lanes -> full unmasked vector stores.
    out_ref[...] = jnp.broadcast_to(pred, (B, OUT_LANES))


def _tensorcores_per_chip():
    """Heuristic: 2 TensorCores per Pallas device on v7x/v4-class chips."""
    try:
        kind = jax.devices()[0].device_kind.lower()
    except Exception:
        return 1
    return 2 if ("v7" in kind or "7x" in kind or "v4" in kind) else 1


def _round_up(v, m):
    return ((v + m - 1) // m) * m


def lstm_model_forward(x_bti, params, *, matmul_dtype=jnp.float32):
    """x_bti: (B, T, I) float32 (batch_first, like the PyTorch module).

    matmul_dtype: dtype for MXU operands (weights + activation casts).  Use
    jnp.bfloat16 on v6e/v7x for higher MXU rate; accumulation stays f32 and
    all gate / state / elementwise math stays f32.
    """
    B, T, I = x_bti.shape
    assert I == 1, "module is defined with input_size=1"
    H = params["w1"].shape[0]
    G = 4 * H

    # ---- batch tiling (generation-aware) ------------------------------------
    n_cores = _tensorcores_per_chip()
    if B <= 128:
        B_pad = _round_up(max(B, 8), 8)
        if n_cores > 1 and B_pad >= 16:
            # v7x: split the batch across the two TensorCores (grid=(2,)).
            TB = _round_up(pl.cdiv(B_pad, n_cores), 8)
            B_pad = _round_up(B_pad, TB)
        else:
            TB = B_pad                      # grid=(1,): no per-step overhead
    else:
        # Large batch: larger tiles amortize MXU push/drain + per-grid-step
        # overhead (v5e/v6e, 128 MiB VMEM); keep <= 256 per core on v7x.
        tb_target = 256 if n_cores > 1 else 512
        TB = min(tb_target, _round_up(B, 8))
        B_pad = _round_up(B, TB)
    grid = (B_pad // TB,)

    x_tbi = jnp.transpose(x_bti, (1, 0, 2))                        # time-major
    if B_pad != B:
        x_tbi = jnp.pad(x_tbi, ((0, 0), (0, B_pad - B), (0, 0)))

    # ---- weight prep (tiny, outside the kernel): transpose / cast ----------
    mdt = matmul_dtype
    w1_row = params["w1"].T                                        # (1, H)
    b1 = params["b1"]                                              # (1, H)
    wih0_t = params["wih0"].T.astype(mdt)                          # (H, 4H)
    whh0_t = params["whh0"].T.astype(mdt)                          # (H, 4H)
    b0 = params["b0"]          # NOTE: b_ih0 + b_hh0 pre-summed    # (1, 4H)
    wih1_t = params["wih1"].T.astype(mdt)                          # (H, 4H)
    whh1_t = params["whh1"].T.astype(mdt)                          # (H, 4H)
    bl1 = params["b1l"]        # NOTE: b_ih1 + b_hh1 pre-summed    # (1, 4H)
    w2a = params["w2"][:, :H]                                      # (1, H)
    w2b = params["w2"][:, H:]                                      # (1, H)
    b2 = params["b2"]                                              # (1, 1)

    # ---- explicit VMEM budget (the (T, TB, 4H) g0 scratch dominates) -------
    scratch_bytes = T * TB * G * 4
    io_bytes = 2 * (T * TB * 4) + 2 * (TB * OUT_LANES * 4)         # dbl-buffered
    w_bytes = 4 * H * G * jnp.dtype(mdt).itemsize * 2 + 8 * G * 4
    vmem_cap = (60 << 20) if n_cores > 1 else (100 << 20)          # v7x: 64 MiB
    vmem_limit = int(min(vmem_cap,
                         max(32 << 20,
                             2 * scratch_bytes + io_bytes + w_bytes + (4 << 20))))
    # TODO(synk): for very long sequences, chunk the hoisted input projection
    # over T (fill a (Tc, TB, 4H) scratch inside the loop) instead of sizing
    # the scratch with T, so v7x's smaller VMEM is never exceeded.

    def full_spec(shape):
        nd = len(shape)
        return pl.BlockSpec(shape, lambda b, nd=nd: (0,) * nd)

    out = pl.pallas_call(
        lstm_model_kernel,
        out_shape=jax.ShapeDtypeStruct((B_pad, OUT_LANES), jnp.float32),
        grid=grid,
        in_specs=[
            pl.BlockSpec((T, TB, 1), lambda b: (0, b, 0)),         # x (batch-tiled)
            full_spec((1, H)), full_spec((1, H)),                  # linear_1
            full_spec((H, G)), full_spec((H, G)), full_spec((1, G)),   # LSTM layer 0
            full_spec((H, G)), full_spec((H, G)), full_spec((1, G)),   # LSTM layer 1
            full_spec((1, H)), full_spec((1, H)), full_spec((1, 1)),   # linear_2
        ],
        out_specs=pl.BlockSpec((TB, OUT_LANES), lambda b: (b, 0)),
        scratch_shapes=[pltpu.VMEM((T, TB, G), jnp.float32)],
        compiler_params=pltpu.CompilerParams(
            dimension_semantics=("parallel",),
            vmem_limit_bytes=vmem_limit),
    )(x_tbi, w1_row, b1, wih0_t, whh0_t, b0, wih1_t, whh1_t, bl1,
      w2a, w2b, b2)

    # predictions[:, -1] with output_size == 1 -> column 0; drop batch padding
    # and the lane broadcast.
    return out[:B, 0]


def make_params(key, input_size=1, hidden=32):
    H = hidden
    ks = jax.random.split(key, 8)
    p = {
        "w1":   jax.random.normal(ks[0], (H, input_size), jnp.float32) * 0.5,
        "b1":   jax.random.normal(ks[1], (1, H), jnp.float32) * 0.1,
        # LSTM weights: kaiming/orthogonal in torch; deterministic normals here.
        "wih0": jax.random.normal(ks[2], (4 * H, H), jnp.float32) * 0.2,
        "whh0": jax.random.normal(ks[3], (4 * H, H), jnp.float32) * 0.2,
        # init_weights() sets LSTM biases to 0.0 (b_ih + b_hh folded together).
        "b0":   jnp.zeros((1, 4 * H), jnp.float32),
        "wih1": jax.random.normal(ks[4], (4 * H, H), jnp.float32) * 0.2,
        "whh1": jax.random.normal(ks[5], (4 * H, H), jnp.float32) * 0.2,
        "b1l":  jnp.zeros((1, 4 * H), jnp.float32),
        "w2":   jax.random.normal(ks[6], (1, 2 * H), jnp.float32) * 0.2,
        "b2":   jax.random.normal(ks[7], (1, 1), jnp.float32) * 0.1,
    }
    return p


def reference_forward(x, params):
    """Pure-JAX reference matching the PyTorch forward (inference mode)."""
    B, T, I = x.shape
    H = params["w1"].shape[0]
    z = jax.nn.relu(jnp.einsum("bti,hi->bth", x, params["w1"]) + params["b1"][0])

    def cell(xt, h, c, wih, whh, b):
        gates = xt @ wih.T + h @ whh.T + b[0]
        i = jax.nn.sigmoid(gates[:, :H])
        f = jax.nn.sigmoid(gates[:, H:2 * H])
        g = jnp.tanh(gates[:, 2 * H:3 * H])
        o = jax.nn.sigmoid(gates[:, 3 * H:])
        c = f * c + i * g
        h = o * jnp.tanh(c)
        return h, c

    h0 = c0 = h1 = c1 = jnp.zeros((B, H), jnp.float32)
    for t in range(T):
        h0, c0 = cell(z[:, t], h0, c0, params["wih0"], params["whh0"], params["b0"])
        h1, c1 = cell(h0, h1, c1, params["wih1"], params["whh1"], params["b1l"])
    feat = jnp.concatenate([h0, h1], axis=-1)
    pred = feat @ params["w2"].T + params["b2"][0]
    return pred[:, -1]


if __name__ == "__main__":
    B, T, I, H = 2, 8, 1, 32
    key = jax.random.PRNGKey(0)
    k_x, k_p = jax.random.split(key)
    x = jax.random.normal(k_x, (B, T, I), jnp.float32)
    params = make_params(k_p, input_size=I, hidden=H)

    ref = reference_forward(x, params)

    # f32 MXU operands: matches the reference to tight tolerance.
    out = jax.block_until_ready(lstm_model_forward(x, params))
    assert out.shape == (B,)
    assert jnp.allclose(out, ref, atol=1e-5, rtol=1e-5), (out, ref)

    # bf16 MXU operands (f32 accumulate, f32 gate/state math): looser tolerance.
    out_bf16 = jax.block_until_ready(
        lstm_model_forward(x, params, matmul_dtype=jnp.bfloat16))
    assert out_bf16.shape == (B,)
    assert jnp.allclose(out_bf16, ref, atol=1e-1, rtol=1e-1), (out_bf16, ref)

    print("KERNEL_OK")
</pallas_src>

<mosaic_0001>
module attributes {stable_mosaic.version = 11 : i64} {
  func.func @lstm_model_kernel(%arg0: i32, %arg1: memref<8x8x1xf32, #tpu.memory_space<vmem>>, %arg2: memref<1x32xf32, #tpu.memory_space<vmem>>, %arg3: memref<1x32xf32, #tpu.memory_space<vmem>>, %arg4: memref<32x128xf32, #tpu.memory_space<vmem>>, %arg5: memref<32x128xf32, #tpu.memory_space<vmem>>, %arg6: memref<1x128xf32, #tpu.memory_space<vmem>>, %arg7: memref<32x128xf32, #tpu.memory_space<vmem>>, %arg8: memref<32x128xf32, #tpu.memory_space<vmem>>, %arg9: memref<1x128xf32, #tpu.memory_space<vmem>>, %arg10: memref<1x32xf32, #tpu.memory_space<vmem>>, %arg11: memref<1x32xf32, #tpu.memory_space<vmem>>, %arg12: memref<1x1xf32, #tpu.memory_space<vmem>>, %arg13: memref<8x128xf32, #tpu.memory_space<vmem>>, %arg14: memref<8x8x128xf32, #tpu.memory_space<vmem>>) attributes {dimension_semantics = [#tpu.dimension_semantics<parallel>], iteration_bounds = array<i64: 1>, scalar_prefetch = 0 : i64, scratch_operands = 1 : i64, tpu.core_type = #tpu.core_type<tc>, window_params = [{transform_indices = @transform_0, window_bounds = array<i64: 8, 8, 1>}, {pipeline_mode = #tpu.pipeline_mode<synchronous>, transform_indices = @transform_1, window_bounds = array<i64: 1, 32>}, {pipeline_mode = #tpu.pipeline_mode<synchronous>, transform_indices = @transform_2, window_bounds = array<i64: 1, 32>}, {pipeline_mode = #tpu.pipeline_mode<synchronous>, transform_indices = @transform_3, window_bounds = array<i64: 32, 128>}, {pipeline_mode = #tpu.pipeline_mode<synchronous>, transform_indices = @transform_4, window_bounds = array<i64: 32, 128>}, {pipeline_mode = #tpu.pipeline_mode<synchronous>, transform_indices = @transform_5, window_bounds = array<i64: 1, 128>}, {pipeline_mode = #tpu.pipeline_mode<synchronous>, transform_indices = @transform_6, window_bounds = array<i64: 32, 128>}, {pipeline_mode = #tpu.pipeline_mode<synchronous>, transform_indices = @transform_7, window_bounds = array<i64: 32, 128>}, {pipeline_mode = #tpu.pipeline_mode<synchronous>, transform_indices = @transform_8, window_bounds = array<i64: 1, 128>}, {pipeline_mode = #tpu.pipeline_mode<synchronous>, transform_indices = @transform_9, window_bounds = array<i64: 1, 32>}, {pipeline_mode = #tpu.pipeline_mode<synchronous>, transform_indices = @transform_10, window_bounds = array<i64: 1, 32>}, {pipeline_mode = #tpu.pipeline_mode<synchronous>, transform_indices = @transform_11, window_bounds = array<i64: 1, 1>}, {transform_indices = @transform_12, window_bounds = array<i64: 8, 128>}]} {
    %c0 = arith.constant 0 : index
    %c0_0 = arith.constant 0 : index
    %c0_1 = arith.constant 0 : index
    %0 = vector.load %arg1[%c0, %c0_0, %c0_1] : memref<8x8x1xf32, #tpu.memory_space<vmem>>, vector<8x8x1xf32>
    %1 = vector.shape_cast %0 : vector<8x8x1xf32> to vector<64x1xf32>
    %c0_2 = arith.constant 0 : index
    %c0_3 = arith.constant 0 : index
    %2 = vector.load %arg2[%c0_2, %c0_3] : memref<1x32xf32, #tpu.memory_space<vmem>>, vector<1x32xf32>
    %3 = vector.broadcast %1 : vector<64x1xf32> to vector<64x32xf32>
    %4 = vector.broadcast %2 : vector<1x32xf32> to vector<64x32xf32>
    %5 = arith.mulf %3, %4 : vector<64x32xf32>
    %c0_4 = arith.constant 0 : index
    %c0_5 = arith.constant 0 : index
    %6 = vector.load %arg3[%c0_4, %c0_5] : memref<1x32xf32, #tpu.memory_space<vmem>>, vector<1x32xf32>
    %7 = vector.broadcast %6 : vector<1x32xf32> to vector<64x32xf32>
    %8 = arith.addf %5, %7 : vector<64x32xf32>
    %cst = arith.constant 0.000000e+00 : f32
    %9 = vector.broadcast %cst : f32 to vector<64x32xf32>
    %10 = arith.maximumf %8, %9 : vector<64x32xf32>
    %c0_6 = arith.constant 0 : index
    %c0_7 = arith.constant 0 : index
    %11 = vector.load %arg4[%c0_6, %c0_7] : memref<32x128xf32, #tpu.memory_space<vmem>>, vector<32x128xf32>
    %cst_8 = arith.constant dense<0.000000e+00> : vector<64x128xf32>
    %12 = tpu.matmul %10, %11, %cst_8 {dimension_numbers = #tpu.dot_dimension_numbers<[1], [0], [0], [1], [0, 0, 1, 1], [], []>} : vector<64x32xf32>, vector<32x128xf32>, vector<64x128xf32> -> vector<64x128xf32>
    %c0_9 = arith.constant 0 : index
    %c0_10 = arith.constant 0 : index
    %13 = vector.load %arg6[%c0_9, %c0_10] : memref<1x128xf32, #tpu.memory_space<vmem>>, vector<1x128xf32>
    %14 = vector.broadcast %13 : vector<1x128xf32> to vector<64x128xf32>
    %15 = arith.addf %12, %14 : vector<64x128xf32>
    %16 = vector.shape_cast %15 : vector<64x128xf32> to vector<8x8x128xf32>
    %c0_11 = arith.constant 0 : index
    %c0_12 = arith.constant 0 : index
    %c0_13 = arith.constant 0 : index
    %17 = vector.load %arg14[%c0_11, %c0_12, %c0_13] : memref<8x8x128xf32, #tpu.memory_space<vmem>>, vector<8x8x128xf32>
    tpu.vector_store %arg14[%c0_11, %c0_12, %c0_13], %16 {strides = array<i32>} : memref<8x8x128xf32, #tpu.memory_space<vmem>>, vector<8x8x128xf32>,
    %c0_14 = arith.constant 0 : index
    %c0_15 = arith.constant 0 : index
    %18 = vector.load %arg5[%c0_14, %c0_15] : memref<32x128xf32, #tpu.memory_space<vmem>>, vector<32x128xf32>
    %c0_16 = arith.constant 0 : index
    %c0_17 = arith.constant 0 : index
    %19 = vector.load %arg8[%c0_16, %c0_17] : memref<32x128xf32, #tpu.memory_space<vmem>>, vector<32x128xf32>
    %c0_18 = arith.constant 0 : index
    %c0_19 = arith.constant 0 : index
    %20 = vector.load %arg7[%c0_18, %c0_19] : memref<32x128xf32, #tpu.memory_space<vmem>>, vector<32x128xf32>
    %c0_20 = arith.constant 0 : index
    %c0_21 = arith.constant 0 : index
    %21 = vector.load %arg9[%c0_20, %c0_21] : memref<1x128xf32, #tpu.memory_space<vmem>>, vector<1x128xf32>
    %22 = vector.shape_cast %21 : vector<1x128xf32> to vector<1x128xf32>
    %23 = vector.broadcast %22 : vector<1x128xf32> to vector<8x128xf32>
    %24 = tpu.iota {dimensions = array<i32: 1>} : vector<8x128xi32>
    %c64_i32 = arith.constant 64 : i32
    %25 = vector.broadcast %c64_i32 : i32 to vector<8x128xi32>
    %26 = arith.cmpi sge, %24, %25 : vector<8x128xi32>
    %c96_i32 = arith.constant 96 : i32
    %27 = vector.broadcast %c96_i32 : i32 to vector<8x128xi32>
    %28 = arith.cmpi slt, %24, %27 : vector<8x128xi32>
    %29 = arith.andi %26, %28 : vector<8x128xi1>
    %cst_22 = arith.constant 0.000000e+00 : f32
    %30 = vector.broadcast %cst_22 : f32 to vector<8x32xf32>
    %cst_23 = arith.constant 0.000000e+00 : f32
    %31 = vector.broadcast %cst_23 : f32 to vector<8x128xf32>
    %c0_i32 = arith.constant 0 : i32
    %cst_24 = arith.constant dense<0.000000e+00> : vector<8x128xf32>
    %32 = tpu.matmul %30, %18, %cst_24 {dimension_numbers = #tpu.dot_dimension_numbers<[1], [0], [0], [1], [0, 0, 1, 1], [], []>} : vector<8x32xf32>, vector<32x128xf32>, vector<8x128xf32> -> vector<8x128xf32>
    %cst_25 = arith.constant dense<0.000000e+00> : vector<8x128xf32>
    %33 = tpu.matmul %30, %19, %cst_25 {dimension_numbers = #tpu.dot_dimension_numbers<[1], [0], [0], [1], [0, 0, 1, 1], [], []>} : vector<8x32xf32>, vector<32x128xf32>, vector<8x128xf32> -> vector<8x128xf32>
    %34 = arith.addf %33, %23 : vector<8x128xf32>
    %35 = arith.index_cast %c0_i32 : i32 to index
    %c0_26 = arith.constant 0 : index
    %c0_27 = arith.constant 0 : index
    %36 = vector.load %arg14[%35, %c0_26, %c0_27] : memref<8x8x128xf32, #tpu.memory_space<vmem>>, vector<1x8x128xf32>
    %37 = vector.shape_cast %36 : vector<1x8x128xf32> to vector<8x128xf32>
    %38 = arith.addf %37, %32 : vector<8x128xf32>
    %39 = math.tanh %38 : vector<8x128xf32>
    %40 = arith.negf %38 : vector<8x128xf32>
    %41 = math.exp %40 : vector<8x128xf32>
    %cst_28 = arith.constant 1.000000e+00 : f32
    %42 = vector.broadcast %cst_28 : f32 to vector<8x128xf32>
    %43 = arith.addf %42, %41 : vector<8x128xf32>
    %44 = arith.divf %42, %43 : vector<8x128xf32>
    %45 = arith.select %29, %39, %44 : vector<8x128xi1>, vector<8x128xf32>
    %c96_i32_29 = arith.constant 96 : i32
    %46 = tpu.dynamic_rotate %45 by %c96_i32_29 dim 1 : vector<8x128xf32>, i32 -> vector<8x128xf32>
    %c64_i32_30 = arith.constant 64 : i32
    %47 = tpu.dynamic_rotate %45 by %c64_i32_30 dim 1 : vector<8x128xf32>, i32 -> vector<8x128xf32>
    %c32_i32 = arith.constant 32 : i32
    %48 = tpu.dynamic_rotate %45 by %c32_i32 dim 1 : vector<8x128xf32>, i32 -> vector<8x128xf32>
    %49 = arith.mulf %46, %31 : vector<8x128xf32>
    %50 = arith.mulf %45, %47 : vector<8x128xf32>
    %51 = arith.addf %49, %50 : vector<8x128xf32>
    %52 = math.tanh %51 : vector<8x128xf32>
    %53 = arith.mulf %48, %52 : vector<8x128xf32>
    %54 = vector.extract_strided_slice %53 {offsets = [0, 0], sizes = [8, 32], strides = [1, 1]} : vector<8x128xf32> to vector<8x32xf32>
    %cst_31 = arith.constant dense<0.000000e+00> : vector<8x128xf32>
    %55 = tpu.matmul %54, %20, %cst_31 {dimension_numbers = #tpu.dot_dimension_numbers<[1], [0], [0], [1], [0, 0, 1, 1], [], []>} : vector<8x32xf32>, vector<32x128xf32>, vector<8x128xf32> -> vector<8x128xf32>
    %56 = arith.addf %55, %34 : vector<8x128xf32>
    %57 = math.tanh %56 : vector<8x128xf32>
    %58 = arith.negf %56 : vector<8x128xf32>
    %59 = math.exp %58 : vector<8x128xf32>
    %cst_32 = arith.constant 1.000000e+00 : f32
    %60 = vector.broadcast %cst_32 : f32 to vector<8x128xf32>
    %61 = arith.addf %60, %59 : vector<8x128xf32>
    %62 = arith.divf %60, %61 : vector<8x128xf32>
    %63 = arith.select %29, %57, %62 : vector<8x128xi1>, vector<8x128xf32>
    %c96_i32_33 = arith.constant 96 : i32
    %64 = tpu.dynamic_rotate %63 by %c96_i32_33 dim 1 : vector<8x128xf32>, i32 -> vector<8x128xf32>
    %c64_i32_34 = arith.constant 64 : i32
    %65 = tpu.dynamic_rotate %63 by %c64_i32_34 dim 1 : vector<8x128xf32>, i32 -> vector<8x128xf32>
    %c32_i32_35 = arith.constant 32 : i32
    %66 = tpu.dynamic_rotate %63 by %c32_i32_35 dim 1 : vector<8x128xf32>, i32 -> vector<8x128xf32>
    %67 = arith.mulf %64, %31 : vector<8x128xf32>
    %68 = arith.mulf %63, %65 : vector<8x128xf32>
    %69 = arith.addf %67, %68 : vector<8x128xf32>
    %70 = math.tanh %69 : vector<8x128xf32>
    %71 = arith.mulf %66, %70 : vector<8x128xf32>
    %72 = vector.extract_strided_slice %71 {offsets = [0, 0], sizes = [8, 32], strides = [1, 1]} : vector<8x128xf32> to vector<8x32xf32>
    %c1_i32 = arith.constant 1 : i32
    %cst_36 = arith.constant dense<0.000000e+00> : vector<8x128xf32>
    %73 = tpu.matmul %54, %18, %cst_36 {dimension_numbers = #tpu.dot_dimension_numbers<[1], [0], [0], [1], [0, 0, 1, 1], [], []>} : vector<8x32xf32>, vector<32x128xf32>, vector<8x128xf32> -> vector<8x128xf32>
    %cst_37 = arith.constant dense<0.000000e+00> : vector<8x128xf32>
    %74 = tpu.matmul %72, %19, %cst_37 {dimension_numbers = #tpu.dot_dimension_numbers<[1], [0], [0], [1], [0, 0, 1, 1], [], []>} : vector<8x32xf32>, vector<32x128xf32>, vector<8x128xf32> -> vector<8x128xf32>
    %75 = arith.addf %74, %23 : vector<8x128xf32>
    %76 = arith.index_cast %c1_i32 : i32 to index
    %c0_38 = arith.constant 0 : index
    %c0_39 = arith.constant 0 : index
    %77 = vector.load %arg14[%76, %c0_38, %c0_39] : memref<8x8x128xf32, #tpu.memory_space<vmem>>, vector<1x8x128xf32>
    %78 = vector.shape_cast %77 : vector<1x8x128xf32> to vector<8x128xf32>
    %79 = arith.addf %78, %73 : vector<8x128xf32>
    %80 = math.tanh %79 : vector<8x128xf32>
    %81 = arith.negf %79 : vector<8x128xf32>
    %82 = math.exp %81 : vector<8x128xf32>
    %cst_40 = arith.constant 1.000000e+00 : f32
    %83 = vector.broadcast %cst_40 : f32 to vector<8x128xf32>
    %84 = arith.addf %83, %82 : vector<8x128xf32>
    %85 = arith.divf %83, %84 : vector<8x128xf32>
    %86 = arith.select %29, %80, %85 : vector<8x128xi1>, vector<8x128xf32>
    %c96_i32_41 = arith.constant 96 : i32
    %87 = tpu.dynamic_rotate %86 by %c96_i32_41 dim 1 : vector<8x128xf32>, i32 -> vector<8x128xf32>
    %c64_i32_42 = arith.constant 64 : i32
    %88 = tpu.dynamic_rotate %86 by %c64_i32_42 dim 1 : vector<8x128xf32>, i32 -> vector<8x128xf32>
    %c32_i32_43 = arith.constant 32 : i32
    %89 = tpu.dynamic_rotate %86 by %c32_i32_43 dim 1 : vector<8x128xf32>, i32 -> vector<8x128xf32>
    %90 = arith.mulf %87, %51 : vector<8x128xf32>
    %91 = arith.mulf %86, %88 : vector<8x128xf32>
    %92 = arith.addf %90, %91 : vector<8x128xf32>
    %93 = math.tanh %92 : vector<8x128xf32>
    %94 = arith.mulf %89, %93 : vector<8x128xf32>
    %95 = vector.extract_strided_slice %94 {offsets = [0, 0], sizes = [8, 32], strides = [1, 1]} : vector<8x128xf32> to vector<8x32xf32>
    %cst_44 = arith.constant dense<0.000000e+00> : vector<8x128xf32>
    %96 = tpu.matmul %95, %20, %cst_44 {dimension_numbers = #tpu.dot_dimension_numbers<[1], [0], [0], [1], [0, 0, 1, 1], [], []>} : vector<8x32xf32>, vector<32x128xf32>, vector<8x128xf32> -> vector<8x128xf32>
    %97 = arith.addf %96, %75 : vector<8x128xf32>
    %98 = math.tanh %97 : vector<8x128xf32>
    %99 = arith.negf %97 : vector<8x128xf32>
    %100 = math.exp %99 : vector<8x128xf32>
    %cst_45 = arith.constant 1.000000e+00 : f32
    %101 = vector.broadcast %cst_45 : f32 to vector<8x128xf32>
    %102 = arith.addf %101, %100 : vector<8x128xf32>
    %103 = arith.divf %101, %102 : vector<8x128xf32>
    %104 = arith.select %29, %98, %103 : vector<8x128xi1>, vector<8x128xf32>
    %c96_i32_46 = arith.constant 96 : i32
    %105 = tpu.dynamic_rotate %104 by %c96_i32_46 dim 1 : vector<8x128xf32>, i32 -> vector<8x128xf32>
    %c64_i32_47 = arith.constant 64 : i32
    %106 = tpu.dynamic_rotate %104 by %c64_i32_47 dim 1 : vector<8x128xf32>, i32 -> vector<8x128xf32>
    %c32_i32_48 = arith.constant 32 : i32
    %107 = tpu.dynamic_rotate %104 by %c32_i32_48 dim 1 : vector<8x128xf32>, i32 -> vector<8x128xf32>
    %108 = arith.mulf %105, %69 : vector<8x128xf32>
    %109 = arith.mulf %104, %106 : vector<8x128xf32>
    %110 = arith.addf %108, %109 : vector<8x128xf32>
    %111 = math.tanh %110 : vector<8x128xf32>
    %112 = arith.mulf %107, %111 : vector<8x128xf32>
    %113 = vector.extract_strided_slice %112 {offsets = [0, 0], sizes = [8, 32], strides = [1, 1]} : vector<8x128xf32> to vector<8x32xf32>
    %c2_i32 = arith.constant 2 : i32
    %cst_49 = arith.constant dense<0.000000e+00> : vector<8x128xf32>
    %114 = tpu.matmul %95, %18, %cst_49 {dimension_numbers = #tpu.dot_dimension_numbers<[1], [0], [0], [1], [0, 0, 1, 1], [], []>} : vector<8x32xf32>, vector<32x128xf32>, vector<8x128xf32> -> vector<8x128xf32>
    %cst_50 = arith.constant dense<0.000000e+00> : vector<8x128xf32>
    %115 = tpu.matmul %113, %19, %cst_50 {dimension_numbers = #tpu.dot_dimension_numbers<[1], [0], [0], [1], [0, 0, 1, 1], [], []>} : vector<8x32xf32>, vector<32x128xf32>, vector<8x128xf32> -> vector<8x128xf32>
    %116 = arith.addf %115, %23 : vector<8x128xf32>
    %117 = arith.index_cast %c2_i32 : i32 to index
    %c0_51 = arith.constant 0 : index
    %c0_52 = arith.constant 0 : index
    %118 = vector.load %arg14[%117, %c0_51, %c0_52] : memref<8x8x128xf32, #tpu.memory_space<vmem>>, vector<1x8x128xf32>
    %119 = vector.shape_cast %118 : vector<1x8x128xf32> to vector<8x128xf32>
    %120 = arith.addf %119, %114 : vector<8x128xf32>
    %121 = math.tanh %120 : vector<8x128xf32>
    %122 = arith.negf %120 : vector<8x128xf32>
    %123 = math.exp %122 : vector<8x128xf32>
    %cst_53 = arith.constant 1.000000e+00 : f32
    %124 = vector.broadcast %cst_53 : f32 to vector<8x128xf32>
    %125 = arith.addf %124, %123 : vector<8x128xf32>
    %126 = arith.divf %124, %125 : vector<8x128xf32>
    %127 = arith.select %29, %121, %126 : vector<8x128xi1>, vector<8x128xf32>
    %c96_i32_54 = arith.constant 96 : i32
    %128 = tpu.dynamic_rotate %127 by %c96_i32_54 dim 1 : vector<8x128xf32>, i32 -> vector<8x128xf32>
    %c64_i32_55 = arith.constant 64 : i32
    %129 = tpu.dynamic_rotate %127 by %c64_i32_55 dim 1 : vector<8x128xf32>, i32 -> vector<8x128xf32>
    %c32_i32_56 = arith.constant 32 : i32
    %130 = tpu.dynamic_rotate %127 by %c32_i32_56 dim 1 : vector<8x128xf32>, i32 -> vector<8x128xf32>
    %131 = arith.mulf %128, %92 : vector<8x128xf32>
    %132 = arith.mulf %127, %129 : vector<8x128xf32>
    %133 = arith.addf %131, %132 : vector<8x128xf32>
    %134 = math.tanh %133 : vector<8x128xf32>
    %135 = arith.mulf %130, %134 : vector<8x128xf32>
    %136 = vector.extract_strided_slice %135 {offsets = [0, 0], sizes = [8, 32], strides = [1, 1]} : vector<8x128xf32> to vector<8x32xf32>
    %cst_57 = arith.constant dense<0.000000e+00> : vector<8x128xf32>
    %137 = tpu.matmul %136, %20, %cst_57 {dimension_numbers = #tpu.dot_dimension_numbers<[1], [0], [0], [1], [0, 0, 1, 1], [], []>} : vector<8x32xf32>, vector<32x128xf32>, vector<8x128xf32> -> vector<8x128xf32>
    %138 = arith.addf %137, %116 : vector<8x128xf32>
    %139 = math.tanh %138 : vector<8x128xf32>
    %140 = arith.negf %138 : vector<8x128xf32>
    %141 = math.exp %140 : vector<8x128xf32>
    %cst_58 = arith.constant 1.000000e+00 : f32
    %142 = vector.broadcast %cst_58 : f32 to vector<8x128xf32>
    %143 = arith.addf %142, %141 : vector<8x128xf32>
    %144 = arith.divf %142, %143 : vector<8x128xf32>
    %145 = arith.select %29, %139, %144 : vector<8x128xi1>, vector<8x128xf32>
    %c96_i32_59 = arith.constant 96 : i32
    %146 = tpu.dynamic_rotate %145 by %c96_i32_59 dim 1 : vector<8x128xf32>, i32 -> vector<8x128xf32>
    %c64_i32_60 = arith.constant 64 : i32
    %147 = tpu.dynamic_rotate %145 by %c64_i32_60 dim 1 : vector<8x128xf32>, i32 -> vector<8x128xf32>
    %c32_i32_61 = arith.constant 32 : i32
    %148 = tpu.dynamic_rotate %145 by %c32_i32_61 dim 1 : vector<8x128xf32>, i32 -> vector<8x128xf32>
    %149 = arith.mulf %146, %110 : vector<8x128xf32>
    %150 = arith.mulf %145, %147 : vector<8x128xf32>
    %151 = arith.addf %149, %150 : vector<8x128xf32>
    %152 = math.tanh %151 : vector<8x128xf32>
    %153 = arith.mulf %148, %152 : vector<8x128xf32>
    %154 = vector.extract_strided_slice %153 {offsets = [0, 0], sizes = [8, 32], strides = [1, 1]} : vector<8x128xf32> to vector<8x32xf32>
    %c3_i32 = arith.constant 3 : i32
    %cst_62 = arith.constant dense<0.000000e+00> : vector<8x128xf32>
    %155 = tpu.matmul %136, %18, %cst_62 {dimension_numbers = #tpu.dot_dimension_numbers<[1], [0], [0], [1], [0, 0, 1, 1], [], []>} : vector<8x32xf32>, vector<32x128xf32>, vector<8x128xf32> -> vector<8x128xf32>
    %cst_63 = arith.constant dense<0.000000e+00> : vector<8x128xf32>
    %156 = tpu.matmul %154, %19, %cst_63 {dimension_numbers = #tpu.dot_dimension_numbers<[1], [0], [0], [1], [0, 0, 1, 1], [], []>} : vector<8x32xf32>, vector<32x128xf32>, vector<8x128xf32> -> vector<8x128xf32>
    %157 = arith.addf %156, %23 : vector<8x128xf32>
    %158 = arith.index_cast %c3_i32 : i32 to index
    %c0_64 = arith.constant 0 : index
    %c0_65 = arith.constant 0 : index
    %159 = vector.load %arg14[%158, %c0_64, %c0_65] : memref<8x8x128xf32, #tpu.memory_space<vmem>>, vector<1x8x128xf32>
    %160 = vector.shape_cast %159 : vector<1x8x128xf32> to vector<8x128xf32>
    %161 = arith.addf %160, %155 : vector<8x128xf32>
    %162 = math.tanh %161 : vector<8x128xf32>
    %163 = arith.negf %161 : vector<8x128xf32>
    %164 = math.exp %163 : vector<8x128xf32>
    %cst_66 = arith.constant 1.000000e+00 : f32
    %165 = vector.broadcast %cst_66 : f32 to vector<8x128xf32>
    %166 = arith.addf %165, %164 : vector<8x128xf32>
    %167 = arith.divf %165, %166 : vector<8x128xf32>
    %168 = arith.select %29, %162, %167 : vector<8x128xi1>, vector<8x128xf32>
    %c96_i32_67 = arith.constant 96 : i32
    %169 = tpu.dynamic_rotate %168 by %c96_i32_67 dim 1 : vector<8x128xf32>, i32 -> vector<8x128xf32>
    %c64_i32_68 = arith.constant 64 : i32
    %170 = tpu.dynamic_rotate %168 by %c64_i32_68 dim 1 : vector<8x128xf32>, i32 -> vector<8x128xf32>
    %c32_i32_69 = arith.constant 32 : i32
    %171 = tpu.dynamic_rotate %168 by %c32_i32_69 dim 1 : vector<8x128xf32>, i32 -> vector<8x128xf32>
    %172 = arith.mulf %169, %133 : vector<8x128xf32>
    %173 = arith.mulf %168, %170 : vector<8x128xf32>
    %174 = arith.addf %172, %173 : vector<8x128xf32>
    %175 = math.tanh %174 : vector<8x128xf32>
    %176 = arith.mulf %171, %175 : vector<8x128xf32>
    %177 = vector.extract_strided_slice %176 {offsets = [0, 0], sizes = [8, 32], strides = [1, 1]} : vector<8x128xf32> to vector<8x32xf32>
    %cst_70 = arith.constant dense<0.000000e+00> : vector<8x128xf32>
    %178 = tpu.matmul %177, %20, %cst_70 {dimension_numbers = #tpu.dot_dimension_numbers<[1], [0], [0], [1], [0, 0, 1, 1], [], []>} : vector<8x32xf32>, vector<32x128xf32>, vector<8x128xf32> -> vector<8x128xf32>
    %179 = arith.addf %178, %157 : vector<8x128xf32>
    %180 = math.tanh %179 : vector<8x128xf32>
    %181 = arith.negf %179 : vector<8x128xf32>
    %182 = math.exp %181 : vector<8x128xf32>
    %cst_71 = arith.constant 1.000000e+00 : f32
    %183 = vector.broadcast %cst_71 : f32 to vector<8x128xf32>
    %184 = arith.addf %183, %182 : vector<8x128xf32>
    %185 = arith.divf %183, %184 : vector<8x128xf32>
    %186 = arith.select %29, %180, %185 : vector<8x128xi1>, vector<8x128xf32>
    %c96_i32_72 = arith.constant 96 : i32
    %187 = tpu.dynamic_rotate %186 by %c96_i32_72 dim 1 : vector<8x128xf32>, i32 -> vector<8x128xf32>
    %c64_i32_73 = arith.constant 64 : i32
    %188 = tpu.dynamic_rotate %186 by %c64_i32_73 dim 1 : vector<8x128xf32>, i32 -> vector<8x128xf32>
    %c32_i32_74 = arith.constant 32 : i32
    %189 = tpu.dynamic_rotate %186 by %c32_i32_74 dim 1 : vector<8x128xf32>, i32 -> vector<8x128xf32>
    %190 = arith.mulf %187, %151 : vector<8x128xf32>
    %191 = arith.mulf %186, %188 : vector<8x128xf32>
    %192 = arith.addf %190, %191 : vector<8x128xf32>
    %193 = math.tanh %192 : vector<8x128xf32>
    %194 = arith.mulf %189, %193 : vector<8x128xf32>
    %195 = vector.extract_strided_slice %194 {offsets = [0, 0], sizes = [8, 32], strides = [1, 1]} : vector<8x128xf32> to vector<8x32xf32>
    %c4_i32 = arith.constant 4 : i32
    %cst_75 = arith.constant dense<0.000000e+00> : vector<8x128xf32>
    %196 = tpu.matmul %177, %18, %cst_75 {dimension_numbers = #tpu.dot_dimension_numbers<[1], [0], [0], [1], [0, 0, 1, 1], [], []>} : vector<8x32xf32>, vector<32x128xf32>, vector<8x128xf32> -> vector<8x128xf32>
    %cst_76 = arith.constant dense<0.000000e+00> : vector<8x128xf32>
    %197 = tpu.matmul %195, %19, %cst_76 {dimension_numbers = #tpu.dot_dimension_numbers<[1], [0], [0], [1], [0, 0, 1, 1], [], []>} : vector<8x32xf32>, vector<32x128xf32>, vector<8x128xf32> -> vector<8x128xf32>
    %198 = arith.addf %197, %23 : vector<8x128xf32>
    %199 = arith.index_cast %c4_i32 : i32 to index
    %c0_77 = arith.constant 0 : index
    %c0_78 = arith.constant 0 : index
    %200 = vector.load %arg14[%199, %c0_77, %c0_78] : memref<8x8x128xf32, #tpu.memory_space<vmem>>, vector<1x8x128xf32>
    %201 = vector.shape_cast %200 : vector<1x8x128xf32> to vector<8x128xf32>
    %202 = arith.addf %201, %196 : vector<8x128xf32>
    %203 = math.tanh %202 : vector<8x128xf32>
    %204 = arith.negf %202 : vector<8x128xf32>
    %205 = math.exp %204 : vector<8x128xf32>
    %cst_79 = arith.constant 1.000000e+00 : f32
    %206 = vector.broadcast %cst_79 : f32 to vector<8x128xf32>
    %207 = arith.addf %206, %205 : vector<8x128xf32>
    %208 = arith.divf %206, %207 : vector<8x128xf32>
    %209 = arith.select %29, %203, %208 : vector<8x128xi1>, vector<8x128xf32>
    %c96_i32_80 = arith.constant 96 : i32
    %210 = tpu.dynamic_rotate %209 by %c96_i32_80 dim 1 : vector<8x128xf32>, i32 -> vector<8x128xf32>
    %c64_i32_81 = arith.constant 64 : i32
    %211 = tpu.dynamic_rotate %209 by %c64_i32_81 dim 1 : vector<8x128xf32>, i32 -> vector<8x128xf32>
    %c32_i32_82 = arith.constant 32 : i32
    %212 = tpu.dynamic_rotate %209 by %c32_i32_82 dim 1 : vector<8x128xf32>, i32 -> vector<8x128xf32>
    %213 = arith.mulf %210, %174 : vector<8x128xf32>
    %214 = arith.mulf %209, %211 : vector<8x128xf32>
    %215 = arith.addf %213, %214 : vector<8x128xf32>
    %216 = math.tanh %215 : vector<8x128xf32>
    %217 = arith.mulf %212, %216 : vector<8x128xf32>
    %218 = vector.extract_strided_slice %217 {offsets = [0, 0], sizes = [8, 32], strides = [1, 1]} : vector<8x128xf32> to vector<8x32xf32>
    %cst_83 = arith.constant dense<0.000000e+00> : vector<8x128xf32>
    %219 = tpu.matmul %218, %20, %cst_83 {dimension_numbers = #tpu.dot_dimension_numbers<[1], [0], [0], [1], [0, 0, 1, 1], [], []>} : vector<8x32xf32>, vector<32x128xf32>, vector<8x128xf32> -> vector<8x128xf32>
    %220 = arith.addf %219, %198 : vector<8x128xf32>
    %221 = math.tanh %220 : vector<8x128xf32>
    %222 = arith.negf %220 : vector<8x128xf32>
    %223 = math.exp %222 : vector<8x128xf32>
    %cst_84 = arith.constant 1.000000e+00 : f32
    %224 = vector.broadcast %cst_84 : f32 to vector<8x128xf32>
    %225 = arith.addf %224, %223 : vector<8x128xf32>
    %226 = arith.divf %224, %225 : vector<8x128xf32>
    %227 = arith.select %29, %221, %226 : vector<8x128xi1>, vector<8x128xf32>
    %c96_i32_85 = arith.constant 96 : i32
    %228 = tpu.dynamic_rotate %227 by %c96_i32_85 dim 1 : vector<8x128xf32>, i32 -> vector<8x128xf32>
    %c64_i32_86 = arith.constant 64 : i32
    %229 = tpu.dynamic_rotate %227 by %c64_i32_86 dim 1 : vector<8x128xf32>, i32 -> vector<8x128xf32>
    %c32_i32_87 = arith.constant 32 : i32
    %230 = tpu.dynamic_rotate %227 by %c32_i32_87 dim 1 : vector<8x128xf32>, i32 -> vector<8x128xf32>
    %231 = arith.mulf %228, %192 : vector<8x128xf32>
    %232 = arith.mulf %227, %229 : vector<8x128xf32>
    %233 = arith.addf %231, %232 : vector<8x128xf32>
    %234 = math.tanh %233 : vector<8x128xf32>
    %235 = arith.mulf %230, %234 : vector<8x128xf32>
    %236 = vector.extract_strided_slice %235 {offsets = [0, 0], sizes = [8, 32], strides = [1, 1]} : vector<8x128xf32> to vector<8x32xf32>
    %c5_i32 = arith.constant 5 : i32
    %cst_88 = arith.constant dense<0.000000e+00> : vector<8x128xf32>
    %237 = tpu.matmul %218, %18, %cst_88 {dimension_numbers = #tpu.dot_dimension_numbers<[1], [0], [0], [1], [0, 0, 1, 1], [], []>} : vector<8x32xf32>, vector<32x128xf32>, vector<8x128xf32> -> vector<8x128xf32>
    %cst_89 = arith.constant dense<0.000000e+00> : vector<8x128xf32>
    %238 = tpu.matmul %236, %19, %cst_89 {dimension_numbers = #tpu.dot_dimension_numbers<[1], [0], [0], [1], [0, 0, 1, 1], [], []>} : vector<8x32xf32>, vector<32x128xf32>, vector<8x128xf32> -> vector<8x128xf32>
    %239 = arith.addf %238, %23 : vector<8x128xf32>
    %240 = arith.index_cast %c5_i32 : i32 to index
    %c0_90 = arith.constant 0 : index
    %c0_91 = arith.constant 0 : index
    %241 = vector.load %arg14[%240, %c0_90, %c0_91] : memref<8x8x128xf32, #tpu.memory_space<vmem>>, vector<1x8x128xf32>
    %242 = vector.shape_cast %241 : vector<1x8x128xf32> to vector<8x128xf32>
    %243 = arith.addf %242, %237 : vector<8x128xf32>
    %244 = math.tanh %243 : vector<8x128xf32>
    %245 = arith.negf %243 : vector<8x128xf32>
    %246 = math.exp %245 : vector<8x128xf32>
    %cst_92 = arith.constant 1.000000e+00 : f32
    %247 = vector.broadcast %cst_92 : f32 to vector<8x128xf32>
    %248 = arith.addf %247, %246 : vector<8x128xf32>
    %249 = arith.divf %247, %248 : vector<8x128xf32>
    %250 = arith.select %29, %244, %249 : vector<8x128xi1>, vector<8x128xf32>
    %c96_i32_93 = arith.constant 96 : i32
    %251 = tpu.dynamic_rotate %250 by %c96_i32_93 dim 1 : vector<8x128xf32>, i32 -> vector<8x128xf32>
    %c64_i32_94 = arith.constant 64 : i32
    %252 = tpu.dynamic_rotate %250 by %c64_i32_94 dim 1 : vector<8x128xf32>, i32 -> vector<8x128xf32>
    %c32_i32_95 = arith.constant 32 : i32
    %253 = tpu.dynamic_rotate %250 by %c32_i32_95 dim 1 : vector<8x128xf32>, i32 -> vector<8x128xf32>
    %254 = arith.mulf %251, %215 : vector<8x128xf32>
    %255 = arith.mulf %250, %252 : vector<8x128xf32>
    %256 = arith.addf %254, %255 : vector<8x128xf32>
    %257 = math.tanh %256 : vector<8x128xf32>
    %258 = arith.mulf %253, %257 : vector<8x128xf32>
    %259 = vector.extract_strided_slice %258 {offsets = [0, 0], sizes = [8, 32], strides = [1, 1]} : vector<8x128xf32> to vector<8x32xf32>
    %cst_96 = arith.constant dense<0.000000e+00> : vector<8x128xf32>
    %260 = tpu.matmul %259, %20, %cst_96 {dimension_numbers = #tpu.dot_dimension_numbers<[1], [0], [0], [1], [0, 0, 1, 1], [], []>} : vector<8x32xf32>, vector<32x128xf32>, vector<8x128xf32> -> vector<8x128xf32>
    %261 = arith.addf %260, %239 : vector<8x128xf32>
    %262 = math.tanh %261 : vector<8x128xf32>
    %263 = arith.negf %261 : vector<8x128xf32>
    %264 = math.exp %263 : vector<8x128xf32>
    %cst_97 = arith.constant 1.000000e+00 : f32
    %265 = vector.broadcast %cst_97 : f32 to vector<8x128xf32>
    %266 = arith.addf %265, %264 : vector<8x128xf32>
    %267 = arith.divf %265, %266 : vector<8x128xf32>
    %268 = arith.select %29, %262, %267 : vector<8x128xi1>, vector<8x128xf32>
    %c96_i32_98 = arith.constant 96 : i32
    %269 = tpu.dynamic_rotate %268 by %c96_i32_98 dim 1 : vector<8x128xf32>, i32 -> vector<8x128xf32>
    %c64_i32_99 = arith.constant 64 : i32
    %270 = tpu.dynamic_rotate %268 by %c64_i32_99 dim 1 : vector<8x128xf32>, i32 -> vector<8x128xf32>
    %c32_i32_100 = arith.constant 32 : i32
    %271 = tpu.dynamic_rotate %268 by %c32_i32_100 dim 1 : vector<8x128xf32>, i32 -> vector<8x128xf32>
    %272 = arith.mulf %269, %233 : vector<8x128xf32>
    %273 = arith.mulf %268, %270 : vector<8x128xf32>
    %274 = arith.addf %272, %273 : vector<8x128xf32>
    %275 = math.tanh %274 : vector<8x128xf32>
    %276 = arith.mulf %271, %275 : vector<8x128xf32>
    %277 = vector.extract_strided_slice %276 {offsets = [0, 0], sizes = [8, 32], strides = [1, 1]} : vector<8x128xf32> to vector<8x32xf32>
    %c6_i32 = arith.constant 6 : i32
    %cst_101 = arith.constant dense<0.000000e+00> : vector<8x128xf32>
    %278 = tpu.matmul %259, %18, %cst_101 {dimension_numbers = #tpu.dot_dimension_numbers<[1], [0], [0], [1], [0, 0, 1, 1], [], []>} : vector<8x32xf32>, vector<32x128xf32>, vector<8x128xf32> -> vector<8x128xf32>
    %cst_102 = arith.constant dense<0.000000e+00> : vector<8x128xf32>
    %279 = tpu.matmul %277, %19, %cst_102 {dimension_numbers = #tpu.dot_dimension_numbers<[1], [0], [0], [1], [0, 0, 1, 1], [], []>} : vector<8x32xf32>, vector<32x128xf32>, vector<8x128xf32> -> vector<8x128xf32>
    %280 = arith.addf %279, %23 : vector<8x128xf32>
    %281 = arith.index_cast %c6_i32 : i32 to index
    %c0_103 = arith.constant 0 : index
    %c0_104 = arith.constant 0 : index
    %282 = vector.load %arg14[%281, %c0_103, %c0_104] : memref<8x8x128xf32, #tpu.memory_space<vmem>>, vector<1x8x128xf32>
    %283 = vector.shape_cast %282 : vector<1x8x128xf32> to vector<8x128xf32>
    %284 = arith.addf %283, %278 : vector<8x128xf32>
    %285 = math.tanh %284 : vector<8x128xf32>
    %286 = arith.negf %284 : vector<8x128xf32>
    %287 = math.exp %286 : vector<8x128xf32>
    %cst_105 = arith.constant 1.000000e+00 : f32
    %288 = vector.broadcast %cst_105 : f32 to vector<8x128xf32>
    %289 = arith.addf %288, %287 : vector<8x128xf32>
    %290 = arith.divf %288, %289 : vector<8x128xf32>
    %291 = arith.select %29, %285, %290 : vector<8x128xi1>, vector<8x128xf32>
    %c96_i32_106 = arith.constant 96 : i32
    %292 = tpu.dynamic_rotate %291 by %c96_i32_106 dim 1 : vector<8x128xf32>, i32 -> vector<8x128xf32>
    %c64_i32_107 = arith.constant 64 : i32
    %293 = tpu.dynamic_rotate %291 by %c64_i32_107 dim 1 : vector<8x128xf32>, i32 -> vector<8x128xf32>
    %c32_i32_108 = arith.constant 32 : i32
    %294 = tpu.dynamic_rotate %291 by %c32_i32_108 dim 1 : vector<8x128xf32>, i32 -> vector<8x128xf32>
    %295 = arith.mulf %292, %256 : vector<8x128xf32>
    %296 = arith.mulf %291, %293 : vector<8x128xf32>
    %297 = arith.addf %295, %296 : vector<8x128xf32>
    %298 = math.tanh %297 : vector<8x128xf32>
    %299 = arith.mulf %294, %298 : vector<8x128xf32>
    %300 = vector.extract_strided_slice %299 {offsets = [0, 0], sizes = [8, 32], strides = [1, 1]} : vector<8x128xf32> to vector<8x32xf32>
    %cst_109 = arith.constant dense<0.000000e+00> : vector<8x128xf32>
    %301 = tpu.matmul %300, %20, %cst_109 {dimension_numbers = #tpu.dot_dimension_numbers<[1], [0], [0], [1], [0, 0, 1, 1], [], []>} : vector<8x32xf32>, vector<32x128xf32>, vector<8x128xf32> -> vector<8x128xf32>
    %302 = arith.addf %301, %280 : vector<8x128xf32>
    %303 = math.tanh %302 : vector<8x128xf32>
    %304 = arith.negf %302 : vector<8x128xf32>
    %305 = math.exp %304 : vector<8x128xf32>
    %cst_110 = arith.constant 1.000000e+00 : f32
    %306 = vector.broadcast %cst_110 : f32 to vector<8x128xf32>
    %307 = arith.addf %306, %305 : vector<8x128xf32>
    %308 = arith.divf %306, %307 : vector<8x128xf32>
    %309 = arith.select %29, %303, %308 : vector<8x128xi1>, vector<8x128xf32>
    %c96_i32_111 = arith.constant 96 : i32
    %310 = tpu.dynamic_rotate %309 by %c96_i32_111 dim 1 : vector<8x128xf32>, i32 -> vector<8x128xf32>
    %c64_i32_112 = arith.constant 64 : i32
    %311 = tpu.dynamic_rotate %309 by %c64_i32_112 dim 1 : vector<8x128xf32>, i32 -> vector<8x128xf32>
    %c32_i32_113 = arith.constant 32 : i32
    %312 = tpu.dynamic_rotate %309 by %c32_i32_113 dim 1 : vector<8x128xf32>, i32 -> vector<8x128xf32>
    %313 = arith.mulf %310, %274 : vector<8x128xf32>
    %314 = arith.mulf %309, %311 : vector<8x128xf32>
    %315 = arith.addf %313, %314 : vector<8x128xf32>
    %316 = math.tanh %315 : vector<8x128xf32>
    %317 = arith.mulf %312, %316 : vector<8x128xf32>
    %318 = vector.extract_strided_slice %317 {offsets = [0, 0], sizes = [8, 32], strides = [1, 1]} : vector<8x128xf32> to vector<8x32xf32>
    %c7_i32 = arith.constant 7 : i32
    %cst_114 = arith.constant dense<0.000000e+00> : vector<8x128xf32>
    %319 = tpu.matmul %300, %18, %cst_114 {dimension_numbers = #tpu.dot_dimension_numbers<[1], [0], [0], [1], [0, 0, 1, 1], [], []>} : vector<8x32xf32>, vector<32x128xf32>, vector<8x128xf32> -> vector<8x128xf32>
    %cst_115 = arith.constant dense<0.000000e+00> : vector<8x128xf32>
    %320 = tpu.matmul %318, %19, %cst_115 {dimension_numbers = #tpu.dot_dimension_numbers<[1], [0], [0], [1], [0, 0, 1, 1], [], []>} : vector<8x32xf32>, vector<32x128xf32>, vector<8x128xf32> -> vector<8x128xf32>
    %321 = arith.addf %320, %23 : vector<8x128xf32>
    %322 = arith.index_cast %c7_i32 : i32 to index
    %c0_116 = arith.constant 0 : index
    %c0_117 = arith.constant 0 : index
    %323 = vector.load %arg14[%322, %c0_116, %c0_117] : memref<8x8x128xf32, #tpu.memory_space<vmem>>, vector<1x8x128xf32>
    %324 = vector.shape_cast %323 : vector<1x8x128xf32> to vector<8x128xf32>
    %325 = arith.addf %324, %319 : vector<8x128xf32>
    %326 = math.tanh %325 : vector<8x128xf32>
    %327 = arith.negf %325 : vector<8x128xf32>
    %328 = math.exp %327 : vector<8x128xf32>
    %cst_118 = arith.constant 1.000000e+00 : f32
    %329 = vector.broadcast %cst_118 : f32 to vector<8x128xf32>
    %330 = arith.addf %329, %328 : vector<8x128xf32>
    %331 = arith.divf %329, %330 : vector<8x128xf32>
    %332 = arith.select %29, %326, %331 : vector<8x128xi1>, vector<8x128xf32>
    %c96_i32_119 = arith.constant 96 : i32
    %333 = tpu.dynamic_rotate %332 by %c96_i32_119 dim 1 : vector<8x128xf32>, i32 -> vector<8x128xf32>
    %c64_i32_120 = arith.constant 64 : i32
    %334 = tpu.dynamic_rotate %332 by %c64_i32_120 dim 1 : vector<8x128xf32>, i32 -> vector<8x128xf32>
    %c32_i32_121 = arith.constant 32 : i32
    %335 = tpu.dynamic_rotate %332 by %c32_i32_121 dim 1 : vector<8x128xf32>, i32 -> vector<8x128xf32>
    %336 = arith.mulf %333, %297 : vector<8x128xf32>
    %337 = arith.mulf %332, %334 : vector<8x128xf32>
    %338 = arith.addf %336, %337 : vector<8x128xf32>
    %339 = math.tanh %338 : vector<8x128xf32>
    %340 = arith.mulf %335, %339 : vector<8x128xf32>
    %341 = vector.extract_strided_slice %340 {offsets = [0, 0], sizes = [8, 32], strides = [1, 1]} : vector<8x128xf32> to vector<8x32xf32>
    %cst_122 = arith.constant dense<0.000000e+00> : vector<8x128xf32>
    %342 = tpu.matmul %341, %20, %cst_122 {dimension_numbers = #tpu.dot_dimension_numbers<[1], [0], [0], [1], [0, 0, 1, 1], [], []>} : vector<8x32xf32>, vector<32x128xf32>, vector<8x128xf32> -> vector<8x128xf32>
    %343 = arith.addf %342, %321 : vector<8x128xf32>
    %344 = math.tanh %343 : vector<8x128xf32>
    %345 = arith.negf %343 : vector<8x128xf32>
    %346 = math.exp %345 : vector<8x128xf32>
    %cst_123 = arith.constant 1.000000e+00 : f32
    %347 = vector.broadcast %cst_123 : f32 to vector<8x128xf32>
    %348 = arith.addf %347, %346 : vector<8x128xf32>
    %349 = arith.divf %347, %348 : vector<8x128xf32>
    %350 = arith.select %29, %344, %349 : vector<8x128xi1>, vector<8x128xf32>
    %c96_i32_124 = arith.constant 96 : i32
    %351 = tpu.dynamic_rotate %350 by %c96_i32_124 dim 1 : vector<8x128xf32>, i32 -> vector<8x128xf32>
    %c64_i32_125 = arith.constant 64 : i32
    %352 = tpu.dynamic_rotate %350 by %c64_i32_125 dim 1 : vector<8x128xf32>, i32 -> vector<8x128xf32>
    %c32_i32_126 = arith.constant 32 : i32
    %353 = tpu.dynamic_rotate %350 by %c32_i32_126 dim 1 : vector<8x128xf32>, i32 -> vector<8x128xf32>
    %354 = arith.mulf %351, %315 : vector<8x128xf32>
    %355 = arith.mulf %350, %352 : vector<8x128xf32>
    %356 = arith.addf %354, %355 : vector<8x128xf32>
    %357 = math.tanh %356 : vector<8x128xf32>
    %358 = arith.mulf %353, %357 : vector<8x128xf32>
    %359 = vector.extract_strided_slice %358 {offsets = [0, 0], sizes = [8, 32], strides = [1, 1]} : vector<8x128xf32> to vector<8x32xf32>
    %c8_i32 = arith.constant 8 : i32
    %c0_127 = arith.constant 0 : index
    %c0_128 = arith.constant 0 : index
    %360 = vector.load %arg10[%c0_127, %c0_128] : memref<1x32xf32, #tpu.memory_space<vmem>>, vector<1x32xf32>
    %361 = vector.broadcast %360 : vector<1x32xf32> to vector<8x32xf32>
    %362 = arith.mulf %341, %361 : vector<8x32xf32>
    %c0_129 = arith.constant 0 : index
    %c0_130 = arith.constant 0 : index
    %363 = vector.load %arg11[%c0_129, %c0_130] : memref<1x32xf32, #tpu.memory_space<vmem>>, vector<1x32xf32>
    %364 = vector.broadcast %363 : vector<1x32xf32> to vector<8x32xf32>
    %365 = arith.mulf %359, %364 : vector<8x32xf32>
    %366 = arith.addf %362, %365 : vector<8x32xf32>
    %cst_131 = arith.constant dense<0.000000e+00> : vector<8xf32>
    %367 = vector.multi_reduction <add>, %366, %cst_131 [1] : vector<8x32xf32> to vector<8xf32>
    %368 = vector.shape_cast %367 : vector<8xf32> to vector<8x1xf32>
    %c0_132 = arith.constant 0 : index
    %c0_133 = arith.constant 0 : index
    %369 = vector.load %arg12[%c0_132, %c0_133] : memref<1x1xf32, #tpu.memory_space<vmem>>, vector<1x1xf32>
    %370 = vector.broadcast %369 : vector<1x1xf32> to vector<8x1xf32>
    %371 = arith.addf %368, %370 : vector<8x1xf32>
    %372 = vector.shape_cast %371 : vector<8x1xf32> to vector<8x1xf32>
    %373 = vector.broadcast %372 : vector<8x1xf32> to vector<8x128xf32>
    %c0_134 = arith.constant 0 : index
    %c0_135 = arith.constant 0 : index
    %374 = vector.load %arg13[%c0_134, %c0_135] : memref<8x128xf32, #tpu.memory_space<vmem>>, vector<8x128xf32>
    tpu.vector_store %arg13[%c0_134, %c0_135], %373 {strides = array<i32>} : memref<8x128xf32, #tpu.memory_space<vmem>>, vector<8x128xf32>,
    return
  }
  func.func @transform_0(%arg0: i32) -> (i32, i32, i32) {
    %c0_i32 = arith.constant 0 : i32
    %c0_i32_0 = arith.constant 0 : i32
    %c0_i32_1 = arith.constant 0 : i32
    return %c0_i32, %arg0, %c0_i32_0 : i32, i32, i32
  }
  func.func @transform_1(%arg0: i32) -> (i32, i32) {
    %c0_i32 = arith.constant 0 : i32
    %c0_i32_0 = arith.constant 0 : i32
    %c0_i32_1 = arith.constant 0 : i32
    return %c0_i32, %c0_i32_0 : i32, i32
  }
  func.func @transform_2(%arg0: i32) -> (i32, i32) {
    %c0_i32 = arith.constant 0 : i32
    %c0_i32_0 = arith.constant 0 : i32
    %c0_i32_1 = arith.constant 0 : i32
    return %c0_i32, %c0_i32_0 : i32, i32
  }
  func.func @transform_3(%arg0: i32) -> (i32, i32) {
    %c0_i32 = arith.constant 0 : i32
    %c0_i32_0 = arith.constant 0 : i32
    %c0_i32_1 = arith.constant 0 : i32
    return %c0_i32, %c0_i32_0 : i32, i32
  }
  func.func @transform_4(%arg0: i32) -> (i32, i32) {
    %c0_i32 = arith.constant 0 : i32
    %c0_i32_0 = arith.constant 0 : i32
    %c0_i32_1 = arith.constant 0 : i32
    return %c0_i32, %c0_i32_0 : i32, i32
  }
  func.func @transform_5(%arg0: i32) -> (i32, i32) {
    %c0_i32 = arith.constant 0 : i32
    %c0_i32_0 = arith.constant 0 : i32
    %c0_i32_1 = arith.constant 0 : i32
    return %c0_i32, %c0_i32_0 : i32, i32
  }
  func.func @transform_6(%arg0: i32) -> (i32, i32) {
    %c0_i32 = arith.constant 0 : i32
    %c0_i32_0 = arith.constant 0 : i32
    %c0_i32_1 = arith.constant 0 : i32
    return %c0_i32, %c0_i32_0 : i32, i32
  }
  func.func @transform_7(%arg0: i32) -> (i32, i32) {
    %c0_i32 = arith.constant 0 : i32
    %c0_i32_0 = arith.constant 0 : i32
    %c0_i32_1 = arith.constant 0 : i32
    return %c0_i32, %c0_i32_0 : i32, i32
  }
  func.func @transform_8(%arg0: i32) -> (i32, i32) {
    %c0_i32 = arith.constant 0 : i32
    %c0_i32_0 = arith.constant 0 : i32
    %c0_i32_1 = arith.constant 0 : i32
    return %c0_i32, %c0_i32_0 : i32, i32
  }
  func.func @transform_9(%arg0: i32) -> (i32, i32) {
    %c0_i32 = arith.constant 0 : i32
    %c0_i32_0 = arith.constant 0 : i32
    %c0_i32_1 = arith.constant 0 : i32
    return %c0_i32, %c0_i32_0 : i32, i32
  }
  func.func @transform_10(%arg0: i32) -> (i32, i32) {
    %c0_i32 = arith.constant 0 : i32
    %c0_i32_0 = arith.constant 0 : i32
    %c0_i32_1 = arith.constant 0 : i32
    return %c0_i32, %c0_i32_0 : i32, i32
  }
  func.func @transform_11(%arg0: i32) -> (i32, i32) {
    %c0_i32 = arith.constant 0 : i32
    %c0_i32_0 = arith.constant 0 : i32
    %c0_i32_1 = arith.constant 0 : i32
    return %c0_i32, %c0_i32_0 : i32, i32
  }
  func.func @transform_12(%arg0: i32) -> (i32, i32) {
    %c0_i32 = arith.constant 0 : i32
    %c0_i32_0 = arith.constant 0 : i32
    return %arg0, %c0_i32 : i32, i32
  }
}

</mosaic_0001>

<bundles_post_ra>
// kernel: tpu_custom_call.1
= control target key start
LH: loop header
LB: loop body
LE: loop exit
PB: predicated region body
PF: predicated region fallthrough
CT: control target
= control target key end

     0   :  { %s3793_s0 = inlined_call_operand.vmem [shape: f32[8,8,1], index: 0, kind: input, shape index: {}]   ;;  %s3794_s1 = inlined_call_operand.vmem [shape: f32[1,32], index: 1, kind: input, shape index: {}]   ;;  %s3795_s2 = inlined_call_operand.vmem [shape: f32[1,32], index: 2, kind: input, shape index: {}]   ;;  %s3796_s3 = inlined_call_operand.vmem [shape: f32[32,128], index: 3, kind: input, shape index: {}]   ;;  %s3797_s4 = inlined_call_operand.vmem [shape: f32[32,128], index: 4, kind: input, shape index: {}]   ;;  %s3798_s5 = inlined_call_operand.vmem [shape: f32[1,128], index: 5, kind: input, shape index: {}]   ;;  %s3799_s6 = inlined_call_operand.hbm [shape: f32[32,128], index: 6, kind: input, shape index: {}]   ;;  %s3800_s7 = inlined_call_operand.hbm [shape: f32[32,128], index: 7, kind: input, shape index: {}]   ;;  %s3801_s8 = inlined_call_operand.vmem [shape: f32[1,128], index: 8, kind: input, shape index: {}]   ;;  %s3802_s9 = inlined_call_operand.vmem [shape: f32[1,32], index: 9, kind: input, shape index: {}]   ;;  %s3803_s10 = inlined_call_operand.vmem [shape: f32[1,32], index: 10, kind: input, shape index: {}]   ;;  %s3804_s11 = inlined_call_operand.<no memory space> [shape: f32[1,1], index: 11, kind: input, shape index: {}]   ;;  %s3805_s12 = inlined_call_operand.hbm [shape: f32[8,128], index: 12, kind: output, shape index: {}]  }
   0x1   :  { %v17_v0 = vstv %s3804_s11 }
   0x2   :  { %18 = vst [vmem:[#allocation3] sm:$0x1] %v17_v0 }
   0x3   :  { %19 = vsyncpa [#allocation5], 0 }
   0x4   :  { %20 = vsyncpa [#allocation8], 0 }
   0x5   :  { %21 = vsyncpa [#allocation6], 0  ;;  %s3126_s23 = smov [#allocation4]  }
   0x6   :  { %s39_s24 = sshll.u32 %s3126_s23, 4  ;;  %s40_s24 = int_to_ptr.vmem [resolvable:$true] %s39_s24 }
   0x7   :  { %s3068_s25 = scalar_lea.vmem %s40_s24, 512  ;;  %p3073_p1 = scmp.lt.s32.totalorder %s40_s24, %s40_s24 }
   0x8   :  { %p3069_p0 = scmp.ne.s32.totalorder %s40_s24, %s3068_s25  ;;  %p3074_p2 = scmp.lt.s32.totalorder %s3068_s25, %s3068_s25 }
   0xa   :  { %p3075_p3 = por %p3074_p2, %p3073_p1 }
   0xc   :  { %p3076_p4 = pnand %p3075_p3, %p3069_p0 }
   0xe   :  { %3079 = shalt.err (!%p3076_p4)
}
   0xf   :  { %s3127_s26 = smov 128   ;;  %s3128_s27 = smov 8  }
  0x10   :  { %45 = dma.hbm_to_vmem [thread:$0]  %s3799_s6, 512, %s40_s24, [#allocation5], %s3127_s26, %s3127_s26, %s3128_s27  }
  0x11   :  { %s3129_s11 = smov [#allocation7]  }
  0x12   :  { %s51_s30 = sshll.u32 %s3129_s11, 4  ;;  %s52_s30 = int_to_ptr.vmem [resolvable:$true] %s51_s30 }
  0x13   :  { %s3088_s13 = scalar_lea.vmem %s52_s30, 512  ;;  %p3093_p6 = scmp.lt.s32.totalorder %s52_s30, %s52_s30 }
  0x14   :  { %p3089_p5 = scmp.ne.s32.totalorder %s52_s30, %s3088_s13  ;;  %p3094_p7 = scmp.lt.s32.totalorder %s3088_s13, %s3088_s13 }
  0x16   :  { %p3095_p8 = por %p3094_p7, %p3093_p6 }
  0x18   :  { %p3096_p9 = pnand %p3095_p8, %p3089_p5 }
  0x1a   :  { %3099 = shalt.err (!%p3096_p9)
}
  0x1b   :  { %57 = dma.hbm_to_vmem [thread:$0]  %s3800_s7, 512, %s52_s30, [#allocation8], %s3127_s26, %s3127_s26, %s3128_s27  }
  0x1c   :  { %3120 = dma.done.wait [#allocation5], 512  }
  0x1d   :  { %3121 = vsyncadd [#allocation5], 4294966784 }
  0x1e   :  { %3122 = dma.done.wait [#allocation8], 512  }
  0x1f   :  { %3123 = vsyncadd [#allocation8], 4294966784  ;;  %v3130_v1 = vmov 0   ;;  %v72_v2 = vld [vmem:[%s3793_s0] sm:$0xff]  ;;  %v74_v3 = vld [vmem:[%s3793_s0 + $0x10] sm:$0xff]  ;;  %v3131_v7 = vmov 0.0   ;;  %v326_v48 = vlaneseq }
  0x20   :  { %2916 = vset.pattern.permute.xlu0 %v3130_v1  ;;  %2917 = vset.pattern.permute.xlu1 %v3130_v1  ;;  %v73_v4 = vld [vmem:[%s3793_s0 + $0x8] sm:$0xff]  ;;  %v75_v5 = vld [vmem:[%s3793_s0 + $0x18] sm:$0xff]  ;;  %v160_v8 = vld [vmem:[%s3796_s3 + $0x10] sm:$0xff]  ;;  %vm3132_vm0 = vmmov 0   ;;  %vm169_vm1 = vcmask 261120   ;;  %s3133_s22 = smov 64  }
  0x21   :  { %83 = vperm.xlu0 %2916, %v72_v2   ;;  %93 = vperm.xlu1 %2917, %v74_v3   ;;  %v161_v6 = vld [vmem:[%s3796_s3 + $0x18] sm:$0xff]  ;;  %v3239_v10 = vld [vmem:[%s3797_s4 + $0x10] sm:$0xff]  ;;  %v159_v11 = vld [vmem:[%s3796_s3 + $0x8] sm:$0xff]  ;;  %v327_v49 = vand.u32 127, %v326_v48  ;;  %s3134_s23 = smov 96   ;;  %s3135_s11 = smov 32  }
  0x22   :  { %2641 = vmatprep.subr.mxu1 %v3131_v7  ;;  %2621 = vmatprep.subr.mxu0 %v161_v6  ;;  %v3233_v9 = vld [vmem:[%s3797_s4 + $0x18] sm:$0xff]  ;;  %v76_v12 = vld [vmem:[%s3793_s0 + $0x20] sm:$0xff]  ;;  %v3255_v14 = vld [vmem:[%s3797_s4 + $0x8] sm:$0xff] }
  0x23   :  { %2622 = vmatpush3.msra.mxu0 %v161_v6  ;;  %2642 = vmatpush3.msra.mxu1 %v3233_v9  ;;  %v158_v13 = vld [vmem:[%s3796_s3] sm:$0xff]  ;;  %v3308_v51 = vld [vmem:[#allocation7 + $0x10] sm:$0xff]  ;;  %vm328_vm2 = vcmp.ge.s32.totalorder %v327_v49, 64  ;;  %vm329_vm3 = vcmp.lt.s32.totalorder %v327_v49, 96  ;;  %v3314_v53 = vld [vmem:[#allocation7 + $0x8] sm:$0xff] }
  0x24   :  { %2623 = vmatprep.subr.mxu0 %v160_v8  ;;  %2643 = vmatprep.subr.mxu1 %v3131_v7  ;;  %v3261_v15 = vld [vmem:[%s3797_s4] sm:$0xff]  ;;  %vm3322_vm4 = vmand %vm328_vm2, %vm329_vm3  ;;  %v78_v59 = vld [vmem:[%s3793_s0 + $0x30] sm:$0xff] }
  0x25   :  { %88 = vperm.xlu0 %2916, %v73_v4   ;;  %98 = vperm.xlu1 %2917, %v75_v5   ;;  %v3276_v16 = vld [vmem:[%s3794_s1] ss:$0 sm:$0xff]  ;;  %v3320_v54 = vld [vmem:[#allocation7] sm:$0xff]  ;;  %v3346_v61 = vld [vmem:[#allocation4 + $0x10] sm:$0xff] }
  0x26   :  { %2624 = vmatpush3.msra.mxu0 %v160_v8  ;;  %2644 = vmatpush3.msra.mxu1 %v3239_v10  ;;  %v3281_v18 = vld [vmem:[%s3795_s2] ss:$0 sm:$0xff]  ;;  %v77_v60 = vld [vmem:[%s3793_s0 + $0x28] sm:$0xff]  ;;  %v79_v62 = vld [vmem:[%s3793_s0 + $0x38] sm:$0xff]  ;;  %s3136_s2 = smov [#allocation9]  }
  0x27   :  { %2625 = vmatprep.subr.mxu0 %v159_v11  ;;  %2645 = vmatprep.subr.mxu1 %v3131_v7  ;;  %v3303_v41 = vld [vmem:[%s3798_s5] ss:$0 sm:$0xff]  ;;  %v3357_v63 = vld [vmem:[#allocation4 + $0x8] sm:$0xff]  ;;  %v3362_v0 = vld [vmem:[#allocation4] sm:$0xff] }
  0x28   :  { %2626 = vmatpush3.msra.mxu0 %v159_v11  ;;  %2646 = vmatpush3.msra.mxu1 %v3255_v14  ;;  %v3306_v50 = vld [vmem:[#allocation7 + $0x18] sm:$0xff] }
  0x29   :  { %103 = vperm.xlu0 %2916, %v76_v12   ;;  %2627 = vmatprep.subr.mxu0 %v158_v13  ;;  %v3311_v52 = vld [vmem:[#allocation4 + $0x18] sm:$0xff] }
  0x2a   :  { %2628 = vmatpush3.msra.mxu0 %v158_v13  ;;  %2647 = vmatprep.subr.mxu1 %v3131_v7  ;;  %v2487_v55 = vld [vmem:[%s3803_s10] ss:$0 sm:$0xff] }
  0x2b   :  { %2648 = vmatpush3.msra.mxu1 %v3261_v15  ;;  %2649 = vmatprep.mubr.msk.f32.mxu1 %vm3132_vm0, %v3131_v7 }
  0x2c   :  { %2650 = vmatmul.mubr.f32.vlgmr.msra.gmra.mxu1 %v3131_v7  ;;  %2652 = vmatprep.subr.mxu1 %v3131_v7 }
  0x2d   :  { %2663 = vmatprep.subr.mxu0 %v3131_v7  ;;  %2660 = vmatprep.mubr.msk.f32.mxu1 %vm3132_vm0, %v3131_v7 }
  0x2e   :  { %2653 = vmatpush3.msra.mxu1 %v3306_v50 }
  0x2f   :  { %2654 = vmatprep.subr.mxu1 %v3131_v7 }
  0x30   :  { %2655 = vmatpush3.msra.mxu1 %v3308_v51 }
  0x31   :  { %2656 = vmatprep.subr.mxu1 %v3131_v7 }
  0x32   :  { %2657 = vmatpush3.msra.mxu1 %v3314_v53 }
  0x33   :  { %2658 = vmatprep.subr.mxu1 %v3131_v7 }
  0x34   :  { %2659 = vmatpush3.msra.mxu1 %v3320_v54 }
  0x35   :  { %2674 = vmatprep.subr.mxu1 %v3131_v7  ;;  %2661 = vmatmul.mubr.f32.vlgmr.msra.gmra.mxu1 %v3131_v7 }
  0x36   :  { %2675 = vmatpush3.msra.mxu1 %v3233_v9  ;;  %2682 = vmatprep.mubr.msk.f32.mxu1 %vm3132_vm0, %v3131_v7 }
  0x37   :  { %2676 = vmatprep.subr.mxu1 %v3131_v7 }
  0x38   :  { %2677 = vmatpush3.msra.mxu1 %v3239_v10 }
  0x39   :  { %2678 = vmatprep.subr.mxu1 %v3131_v7 }
  0x3a   :  { %2679 = vmatpush3.msra.mxu1 %v3255_v14 }
  0x3b   :  { %2680 = vmatprep.subr.mxu1 %v3131_v7 }
  0x3c   :  { %2681 = vmatpush3.msra.mxu1 %v3261_v15 }
  0x3d   :  { %2696 = vmatprep.subr.mxu1 %v3131_v7 }
  0x9c   :  { %v84_v17 = vpop.permute.xlu0 %83  ;;  %v94_v19 = vpop.permute.xlu1 %93 }
  0x9d   :  { %v127_v20 = vmul.f32 %v3276_v16, %v84_v17  ;;  %v129_v21 = vmul.f32 %v3276_v16, %v94_v19 }
  0x9f   :  { %v142_v22 = vadd.f32 %v3281_v18, %v127_v20  ;;  %v144_v23 = vadd.f32 %v3281_v18, %v129_v21 }
  0xa0   :  { %v89_v24 = vpop.permute.xlu0 %88  ;;  %v99_v25 = vpop.permute.xlu1 %98 }
  0xa1   :  { %v128_v26 = vmul.f32 %v3276_v16, %v89_v24  ;;  %v150_v27 = vmax.f32 %v142_v22, 0.0  ;;  %v130_v28 = vmul.f32 %v3276_v16, %v99_v25  ;;  %v152_v31 = vmax.f32 %v144_v23, 0.0 }
  0xa3   :  { %v143_v29 = vadd.f32 %v3281_v18, %v128_v26  ;;  %2629 = vmatprep.mubr.msk.f32.mxu0 %vm169_vm1, %v150_v27  ;;  %v145_v30 = vadd.f32 %v3281_v18, %v130_v28 }
  0xa4   :  { %v104_v32 = vpop.permute.xlu0 %103 }
  0xa5   :  { %v151_v33 = vmax.f32 %v143_v29, 0.0  ;;  %v131_v34 = vmul.f32 %v3276_v16, %v104_v32  ;;  %v153_v35 = vmax.f32 %v145_v30, 0.0 }
  0xa7   :  { %v146_v36 = vadd.f32 %v3281_v18, %v131_v34  ;;  %2630 = vmatmul.mubr.msk.f32.vlgmr.msra.gmra.mxu0 %vm169_vm1, %v151_v33  ;;  %v3414_v33 = vld [vmem:[%s3801_s8] ss:$0 sm:$0xff] }
  0xa8   :  { %2632 = vmatprep.mubr.msk.f32.mxu0 %vm169_vm1, %v152_v31  ;;  %2664 = vmatpush3.msra.mxu0 %v3311_v52 }
  0xa9   :  { %v154_v37 = vmax.f32 %v146_v36, 0.0  ;;  %2665 = vmatprep.subr.mxu0 %v3131_v7 }
  0xaa   :  { %2666 = vmatpush3.msra.mxu0 %v3346_v61 }
  0xab   :  { %2633 = vmatmul.mubr.msk.f32.gmra.mxu0 %vm169_vm1, %v153_v35  ;;  %2667 = vmatprep.subr.mxu0 %v3131_v7 }
  0xac   :  { %2635 = vmatprep.mubr.msk.f32.mxu0 %vm169_vm1, %v154_v37  ;;  %2668 = vmatpush3.msra.mxu0 %v3357_v63 }
  0xad   :  { %2669 = vmatprep.subr.mxu0 %v3131_v7 }
  0xae   :  { %2670 = vmatpush3.msra.mxu0 %v3362_v0 }
  0xaf   :  { %2685 = vmatprep.subr.mxu0 %v3131_v7 }
  0xec   :  { %v400_v38 = vpop.f32.mrf.mxu1 }
  0xee   :  { %v2651_v39 = vpop.f32.mrf.mxu1 }
 0x167   :  { %v3298_v40 = vpop.f32.mrf.mxu0 }
 0x168   :  { %v266_v31 = vadd.f32 %v3298_v40, %v3303_v41 }
 0x169   :  { %v260_v42 = vpop.f32.mrf.mxu0 }
 0x16a   :  { %v261_v43 = vadd.f32 %v3303_v41, %v260_v42 }
 0x16b   :  { %v3403_v28 = vpop.f32.mrf.mxu0 }
 0x16c   :  { %v475_v44 = vadd.f32 %v400_v38, %v261_v43 }
 0x16d   :  { %v3405_v29 = vpop.f32.mrf.mxu0 }
 0x16e   :  { %v2448_v45 = vmul.f32 -1.442695, %v475_v44 }
 0x170   :  { %2918 = vpow2.f32 %v2448_v45 }
 0x171   :  { %2920 = vtanh.f32 %v475_v44 }
 0x17d   :  { %v2919_v46 = vpop.eup %2918 }
 0x17e   :  { %v480_v47 = vadd.f32 1.0, %v2919_v46  ;;  %v2921_v56 = vpop.eup %2920 }
 0x180   :  { %2922 = vrcp.f32 %v480_v47 }
 0x18d   :  { %v2923_v57 = vpop.eup %2922 }
 0x18e   :  { %v483_v58 = vsel %vm3322_vm4, %v2921_v56, %v2923_v57 }
 0x18f   :  { %486 = vrot.lane.b32.xlu0 %v483_v58, %s3133_s22  ;;  %484 = vrot.lane.b32.xlu1 %v483_v58, %s3134_s23 }
 0x193   :  { %113 = vperm.xlu0 %2916, %v78_v59   ;;  %108 = vperm.xlu1 %2917, %v77_v60  }
 0x197   :  { %488 = vrot.lane.b32.xlu0 %v483_v58, %s3135_s11  ;;  %118 = vperm.xlu1 %2917, %v79_v62  }
 0x201   :  { %v485_v1 = vpop.permute.xlu1 %484  ;;  %v487_v2 = vpop.permute.xlu0 %486 }
 0x202   :  { %v490_v3 = vmul.f32 0.0, %v485_v1  ;;  %v491_v4 = vmul.f32 %v487_v2, %v483_v58 }
 0x204   :  { %v3367_v5 = vadd.f32 %v491_v4, %v490_v3 }
 0x206   :  { %2924 = vtanh.f32 %v3367_v5 }
 0x20e   :  { %v109_v6 = vpop.permute.xlu1 %108  ;;  %v114_v8 = vpop.permute.xlu0 %113 }
 0x20f   :  { %v132_v11 = vmul.f32 %v3276_v16, %v109_v6  ;;  %v133_v12 = vmul.f32 %v3276_v16, %v114_v8 }
 0x211   :  { %v147_v13 = vadd.f32 %v3281_v18, %v132_v11  ;;  %v148_v17 = vadd.f32 %v3281_v18, %v133_v12 }
 0x212   :  { %v119_v19 = vpop.permute.xlu1 %118  ;;  %v489_v20 = vpop.permute.xlu0 %488 }
 0x213   :  { %v2925_v21 = vpop.eup %2924  ;;  %v155_v22 = vmax.f32 %v147_v13, 0.0  ;;  %v156_v23 = vmax.f32 %v148_v17, 0.0  ;;  %v134_v24 = vmul.f32 %v3276_v16, %v119_v19  ;;  %v470_v16 = vpop.f32.mrf.mxu1 }
 0x214   :  { %v494_v25 = vmul.f32 %v2925_v21, %v489_v20  ;;  %v471_v38 = vadd.f32 %v3414_v33, %v470_v16 }
 0x215   :  { %v149_v26 = vadd.f32 %v3281_v18, %v134_v24  ;;  %2636 = vmatmul.mubr.msk.f32.gmra.mxu0 %vm169_vm1, %v155_v22  ;;  %v2662_v18 = vpop.f32.mrf.mxu1 }
 0x216   :  { %2638 = vmatprep.mubr.msk.f32.mxu0 %vm169_vm1, %v156_v23  ;;  %2683 = vmatmul.mubr.msk.f32.vlgmr.msra.gmra.mxu1 %vm169_vm1, %v494_v25 }
 0x217   :  { %v157_v27 = vmax.f32 %v149_v26, 0.0  ;;  %2697 = vmatpush3.msra.mxu1 %v3311_v52  ;;  %2704 = vmatprep.mubr.msk.f32.mxu1 %vm3132_vm0, %v3131_v7 }
 0x218   :  { %2698 = vmatprep.subr.mxu1 %v3131_v7 }
 0x219   :  { %2639 = vmatmul.mubr.msk.f32.gmra.mxu0 %vm169_vm1, %v157_v27  ;;  %2699 = vmatpush3.msra.mxu1 %v3346_v61 }
 0x21a   :  { %2671 = vmatprep.mubr.msk.f32.mxu0 %vm3132_vm0, %v3131_v7  ;;  %2700 = vmatprep.subr.mxu1 %v3131_v7 }
 0x21b   :  { %2701 = vmatpush3.msra.mxu1 %v3357_v63 }
 0x21c   :  { %2702 = vmatprep.subr.mxu1 %v3131_v7 }
 0x21d   :  { %2672 = vmatmul.mubr.msk.f32.vlgmr.msra.gmra.mxu0 %vm169_vm1, %v494_v25  ;;  %2703 = vmatpush3.msra.mxu1 %v3362_v0 }
 0x21e   :  { %2686 = vmatpush3.msra.mxu0 %v3306_v50  ;;  %2693 = vmatprep.mubr.msk.f32.mxu0 %vm3132_vm0, %v3131_v7 }
 0x21f   :  { %2687 = vmatprep.subr.mxu0 %v3131_v7  ;;  %2718 = vmatprep.subr.mxu1 %v3131_v7 }
 0x220   :  { %2688 = vmatpush3.msra.mxu0 %v3308_v51 }
 0x221   :  { %2689 = vmatprep.subr.mxu0 %v3131_v7 }
 0x222   :  { %2690 = vmatpush3.msra.mxu0 %v3314_v53 }
 0x223   :  { %2691 = vmatprep.subr.mxu0 %v3131_v7 }
 0x224   :  { %2692 = vmatpush3.msra.mxu0 %v3320_v54 }
 0x225   :  { %2707 = vmatprep.subr.mxu0 %v3131_v7 }
 0x2d5   :  { %v3407_v30 = vpop.f32.mrf.mxu0 }
 0x2d6   :  { %v653_v32 = vpop.f32.mrf.mxu1 }
 0x2d7   :  { %v3416_v34 = vpop.f32.mrf.mxu0  ;;  %v732_v35 = vadd.f32 %v653_v32, %v266_v31  ;;  %v271_v31 = vadd.f32 %v3303_v41, %v3405_v29 }
 0x2d8   :  { %v2684_v36 = vpop.f32.mrf.mxu1 }
 0x2d9   :  { %v3418_v37 = vpop.f32.mrf.mxu0  ;;  %v2453_v42 = vmul.f32 -1.442695, %v732_v35 }
 0x2db   :  { %v3421_v39 = vpop.f32.mrf.mxu0  ;;  %2926 = vpow2.f32 %v2453_v42 }
 0x2dd   :  { %v564_v43 = vpop.f32.mrf.mxu0 }
 0x2de   :  { %v565_v44 = vadd.f32 %v564_v43, %v471_v38 }
 0x2df   :  { %v2673_v40 = vpop.f32.mrf.mxu0 }
 0x2e0   :  { %v2450_v45 = vmul.f32 -1.442695, %v565_v44 }
 0x2e2   :  { %2928 = vpow2.f32 %v2450_v45 }
 0x2e3   :  { %2930 = vtanh.f32 %v565_v44 }
 0x2e8   :  { %v2927_v46 = vpop.eup %2926 }
 0x2e9   :  { %v737_v48 = vadd.f32 1.0, %v2927_v46 }
 0x2ef   :  { %v2929_v47 = vpop.eup %2928 }
 0x2f0   :  { %v572_v49 = vadd.f32 1.0, %v2929_v47  ;;  %v2931_v56 = vpop.eup %2930 }
 0x2f2   :  { %2932 = vrcp.f32 %v572_v49 }
 0x2f3   :  { %2934 = vrcp.f32 %v737_v48 }
 0x2f4   :  { %2936 = vtanh.f32 %v732_v35 }
 0x2ff   :  { %v2933_v57 = vpop.eup %2932 }
 0x300   :  { %v575_v58 = vsel %vm3322_vm4, %v2931_v56, %v2933_v57  ;;  %v2935_v59 = vpop.eup %2934 }
 0x301   :  { %578 = vrot.lane.b32.xlu0 %v575_v58, %s3133_s22  ;;  %576 = vrot.lane.b32.xlu1 %v575_v58, %s3134_s23  ;;  %v2937_v60 = vpop.eup %2936 }
 0x302   :  { %v740_v62 = vsel %vm3322_vm4, %v2937_v60, %v2935_v59 }
 0x305   :  { %743 = vrot.lane.b32.xlu0 %v740_v62, %s3133_s22  ;;  %741 = vrot.lane.b32.xlu1 %v740_v62, %s3134_s23 }
 0x309   :  { %745 = vrot.lane.b32.xlu0 %v740_v62, %s3135_s11  ;;  %580 = vrot.lane.b32.xlu1 %v575_v58, %s3135_s11 }
 0x373   :  { %v579_v1 = vpop.permute.xlu0 %578  ;;  %v577_v2 = vpop.permute.xlu1 %576 }
 0x374   :  { %v583_v3 = vmul.f32 %v579_v1, %v575_v58  ;;  %v582_v4 = vmul.f32 0.0, %v577_v2 }
 0x376   :  { %v3433_v6 = vadd.f32 %v583_v3, %v582_v4 }
 0x377   :  { %v744_v8 = vpop.permute.xlu0 %743  ;;  %v742_v11 = vpop.permute.xlu1 %741 }
 0x378   :  { %2938 = vtanh.f32 %v3433_v6  ;;  %v748_v12 = vmul.f32 %v744_v8, %v740_v62  ;;  %v747_v13 = vmul.f32 %v742_v11, %v3367_v5 }
 0x37a   :  { %v3437_v17 = vadd.f32 %v748_v12, %v747_v13 }
 0x37b   :  { %v581_v20 = vpop.permute.xlu1 %580  ;;  %v746_v23 = vpop.permute.xlu0 %745 }
 0x37c   :  { %2940 = vtanh.f32 %v3437_v17 }
 0x385   :  { %v2939_v19 = vpop.eup %2938 }
 0x386   :  { %v586_v21 = vmul.f32 %v2939_v19, %v581_v20 }
 0x388   :  { %2694 = vmatmul.mubr.msk.f32.vlgmr.msra.gmra.mxu0 %vm169_vm1, %v586_v21 }
 0x389   :  { %v2941_v22 = vpop.eup %2940  ;;  %2708 = vmatpush3.msra.mxu0 %v3233_v9  ;;  %2715 = vmatprep.mubr.msk.f32.mxu0 %vm3132_vm0, %v3131_v7 }
 0x38a   :  { %v751_v24 = vmul.f32 %v2941_v22, %v746_v23  ;;  %2709 = vmatprep.subr.mxu0 %v3131_v7 }
 0x38b   :  { %2710 = vmatpush3.msra.mxu0 %v3239_v10 }
 0x38c   :  { %2711 = vmatprep.subr.mxu0 %v3131_v7  ;;  %2705 = vmatmul.mubr.msk.f32.vlgmr.msra.gmra.mxu1 %vm169_vm1, %v751_v24 }
 0x38d   :  { %2712 = vmatpush3.msra.mxu0 %v3255_v14  ;;  %2719 = vmatpush3.msra.mxu1 %v3306_v50 }
 0x38e   :  { %2713 = vmatprep.subr.mxu0 %v3131_v7  ;;  %2720 = vmatprep.subr.mxu1 %v3131_v7 }
 0x38f   :  { %2714 = vmatpush3.msra.mxu0 %v3261_v15  ;;  %2721 = vmatpush3.msra.mxu1 %v3308_v51 }
 0x390   :  { %2716 = vmatmul.mubr.msk.f32.vlgmr.msra.gmra.mxu0 %vm169_vm1, %v751_v24  ;;  %2722 = vmatprep.subr.mxu1 %v3131_v7 }
 0x391   :  { %2723 = vmatpush3.msra.mxu1 %v3314_v53  ;;  %2729 = vmatprep.subr.mxu0 %v3131_v7 }
 0x392   :  { %2724 = vmatprep.subr.mxu1 %v3131_v7  ;;  %2730 = vmatpush3.msra.mxu0 %v3311_v52 }
 0x393   :  { %2725 = vmatpush3.msra.mxu1 %v3320_v54  ;;  %2731 = vmatprep.subr.mxu0 %v3131_v7 }
 0x394   :  { %2726 = vmatprep.mubr.msk.f32.mxu1 %vm3132_vm0, %v3131_v7  ;;  %2732 = vmatpush3.msra.mxu0 %v3346_v61 }
 0x395   :  { %2740 = vmatprep.subr.mxu1 %v3131_v7  ;;  %2733 = vmatprep.subr.mxu0 %v3131_v7 }
 0x396   :  { %2734 = vmatpush3.msra.mxu0 %v3357_v63  ;;  %2737 = vmatprep.mubr.msk.f32.mxu0 %vm3132_vm0, %v3131_v7 }
 0x397   :  { %2735 = vmatprep.subr.mxu0 %v3131_v7 }
 0x398   :  { %2736 = vmatpush3.msra.mxu0 %v3362_v0 }
 0x399   :  { %2751 = vmatprep.subr.mxu0 %v3131_v7 }
 0x448   :  { %v726_v5 = vpop.f32.mrf.mxu0 }
 0x449   :  { %v727_v26 = vadd.f32 %v3414_v33, %v726_v5 }
 0x44a   :  { %v2695_v25 = vpop.f32.mrf.mxu0 }
 0x44b   :  { %v276_v25 = vadd.f32 %v3403_v28, %v3303_v41 }
 0x44c   :  { %v821_v27 = vpop.f32.mrf.mxu1 }
 0x44d   :  { %v822_v16 = vadd.f32 %v821_v27, %v727_v26 }
 0x44e   :  { %v2706_v18 = vpop.f32.mrf.mxu1 }
 0x44f   :  { %v2455_v32 = vmul.f32 -1.442695, %v822_v16 }
 0x450   :  { %v910_v35 = vpop.f32.mrf.mxu0 }
 0x451   :  { %2942 = vpow2.f32 %v2455_v32  ;;  %v989_v36 = vadd.f32 %v910_v35, %v271_v31 }
 0x452   :  { %v2717_v38 = vpop.f32.mrf.mxu0 }
 0x453   :  { %v2458_v42 = vmul.f32 -1.442695, %v989_v36 }
 0x455   :  { %2944 = vpow2.f32 %v2458_v42 }
 0x456   :  { %2946 = vtanh.f32 %v822_v16 }
 0x45e   :  { %v2943_v43 = vpop.eup %2942 }
 0x45f   :  { %v829_v44 = vadd.f32 1.0, %v2943_v43 }
 0x461   :  { %2948 = vrcp.f32 %v829_v44 }
 0x462   :  { %v2945_v40 = vpop.eup %2944  ;;  %2950 = vtanh.f32 %v989_v36 }
 0x463   :  { %v994_v45 = vadd.f32 1.0, %v2945_v40  ;;  %v2947_v46 = vpop.eup %2946 }
 0x465   :  { %2952 = vrcp.f32 %v994_v45 }
 0x46e   :  { %v2949_v47 = vpop.eup %2948 }
 0x46f   :  { %v832_v29 = vsel %vm3322_vm4, %v2947_v46, %v2949_v47  ;;  %v2951_v48 = vpop.eup %2950 }
 0x470   :  { %835 = vrot.lane.b32.xlu0 %v832_v29, %s3133_s22  ;;  %833 = vrot.lane.b32.xlu1 %v832_v29, %s3134_s23 }
 0x472   :  { %v2953_v49 = vpop.eup %2952 }
 0x473   :  { %v997_v56 = vsel %vm3322_vm4, %v2951_v48, %v2953_v49 }
 0x474   :  { %1000 = vrot.lane.b32.xlu0 %v997_v56, %s3133_s22  ;;  %998 = vrot.lane.b32.xlu1 %v997_v56, %s3134_s23 }
 0x478   :  { %1002 = vrot.lane.b32.xlu0 %v997_v56, %s3135_s11  ;;  %837 = vrot.lane.b32.xlu1 %v832_v29, %s3135_s11 }
 0x4e2   :  { %v836_v57 = vpop.permute.xlu0 %835  ;;  %v834_v58 = vpop.permute.xlu1 %833 }
 0x4e3   :  { %v840_v59 = vmul.f32 %v836_v57, %v832_v29  ;;  %v839_v60 = vmul.f32 %v834_v58, %v3433_v6 }
 0x4e5   :  { %v3487_v62 = vadd.f32 %v840_v59, %v839_v60 }
 0x4e6   :  { %v1001_v1 = vpop.permute.xlu0 %1000  ;;  %v999_v2 = vpop.permute.xlu1 %998 }
 0x4e7   :  { %2954 = vtanh.f32 %v3487_v62  ;;  %v1005_v3 = vmul.f32 %v1001_v1, %v997_v56  ;;  %v1004_v4 = vmul.f32 %v999_v2, %v3437_v17 }
 0x4e9   :  { %v3491_v8 = vadd.f32 %v1005_v3, %v1004_v4 }
 0x4ea   :  { %v838_v12 = vpop.permute.xlu1 %837  ;;  %v1003_v6 = vpop.permute.xlu0 %1002 }
 0x4eb   :  { %2956 = vtanh.f32 %v3491_v8 }
 0x4f4   :  { %v2955_v11 = vpop.eup %2954 }
 0x4f5   :  { %v843_v13 = vmul.f32 %v2955_v11, %v838_v12 }
 0x4f7   :  { %2727 = vmatmul.mubr.msk.f32.vlgmr.msra.gmra.mxu1 %vm169_vm1, %v843_v13 }
 0x4f8   :  { %v2957_v19 = vpop.eup %2956  ;;  %2741 = vmatpush3.msra.mxu1 %v3233_v9  ;;  %2748 = vmatprep.mubr.msk.f32.mxu1 %vm3132_vm0, %v3131_v7 }
 0x4f9   :  { %v1008_v20 = vmul.f32 %v2957_v19, %v1003_v6  ;;  %2742 = vmatprep.subr.mxu1 %v3131_v7 }
 0x4fa   :  { %2743 = vmatpush3.msra.mxu1 %v3239_v10 }
 0x4fb   :  { %2744 = vmatprep.subr.mxu1 %v3131_v7  ;;  %2738 = vmatmul.mubr.msk.f32.vlgmr.msra.gmra.mxu0 %vm169_vm1, %v1008_v20 }
 0x4fc   :  { %2745 = vmatpush3.msra.mxu1 %v3255_v14  ;;  %2752 = vmatpush3.msra.mxu0 %v3306_v50 }
 0x4fd   :  { %2746 = vmatprep.subr.mxu1 %v3131_v7  ;;  %2753 = vmatprep.subr.mxu0 %v3131_v7 }
 0x4fe   :  { %2747 = vmatpush3.msra.mxu1 %v3261_v15  ;;  %2754 = vmatpush3.msra.mxu0 %v3308_v51 }
 0x4ff   :  { %2749 = vmatmul.mubr.msk.f32.vlgmr.msra.gmra.mxu1 %vm169_vm1, %v1008_v20  ;;  %2755 = vmatprep.subr.mxu0 %v3131_v7 }
 0x500   :  { %2756 = vmatpush3.msra.mxu0 %v3314_v53  ;;  %2762 = vmatprep.subr.mxu1 %v3131_v7 }
 0x501   :  { %2757 = vmatprep.subr.mxu0 %v3131_v7  ;;  %2763 = vmatpush3.msra.mxu1 %v3311_v52 }
 0x502   :  { %2758 = vmatpush3.msra.mxu0 %v3320_v54  ;;  %2764 = vmatprep.subr.mxu1 %v3131_v7 }
 0x503   :  { %2759 = vmatprep.mubr.msk.f32.mxu0 %vm3132_vm0, %v3131_v7  ;;  %2765 = vmatpush3.msra.mxu1 %v3346_v61 }
 0x504   :  { %2773 = vmatprep.subr.mxu0 %v3131_v7  ;;  %2766 = vmatprep.subr.mxu1 %v3131_v7 }
 0x505   :  { %2767 = vmatpush3.msra.mxu1 %v3357_v63  ;;  %2770 = vmatprep.mubr.msk.f32.mxu1 %vm3132_vm0, %v3131_v7 }
 0x506   :  { %2768 = vmatprep.subr.mxu1 %v3131_v7 }
 0x507   :  { %2769 = vmatpush3.msra.mxu1 %v3362_v0 }
 0x508   :  { %2784 = vmatprep.subr.mxu1 %v3131_v7 }
 0x5b7   :  { %v983_v17 = vpop.f32.mrf.mxu1 }
 0x5b8   :  { %v984_v22 = vadd.f32 %v3414_v33, %v983_v17  ;;  %v281_v17 = vadd.f32 %v3303_v41, %v3416_v34 }
 0x5b9   :  { %v2728_v21 = vpop.f32.mrf.mxu1 }
 0x5bb   :  { %v1078_v23 = vpop.f32.mrf.mxu0 }
 0x5bc   :  { %v1079_v24 = vadd.f32 %v1078_v23, %v984_v22 }
 0x5bd   :  { %v2739_v5 = vpop.f32.mrf.mxu0 }
 0x5be   :  { %v2460_v26 = vmul.f32 -1.442695, %v1079_v24 }
 0x5bf   :  { %v1167_v27 = vpop.f32.mrf.mxu1 }
 0x5c0   :  { %2958 = vpow2.f32 %v2460_v26  ;;  %v1246_v16 = vadd.f32 %v1167_v27, %v276_v25 }
 0x5c1   :  { %v2750_v18 = vpop.f32.mrf.mxu1 }
 0x5c2   :  { %v2463_v31 = vmul.f32 -1.442695, %v1246_v16 }
 0x5c4   :  { %2960 = vpow2.f32 %v2463_v31 }
 0x5c5   :  { %2962 = vtanh.f32 %v1079_v24 }
 0x5cd   :  { %v2959_v32 = vpop.eup %2958 }
 0x5ce   :  { %v1086_v35 = vadd.f32 1.0, %v2959_v32 }
 0x5d0   :  { %2964 = vrcp.f32 %v1086_v35 }
 0x5d1   :  { %v2961_v36 = vpop.eup %2960  ;;  %2966 = vtanh.f32 %v1246_v16 }
 0x5d2   :  { %v1251_v38 = vadd.f32 1.0, %v2961_v36  ;;  %v2963_v42 = vpop.eup %2962 }
 0x5d4   :  { %2968 = vrcp.f32 %v1251_v38 }
 0x5dd   :  { %v2965_v43 = vpop.eup %2964 }
 0x5de   :  { %v1089_v28 = vsel %vm3322_vm4, %v2963_v42, %v2965_v43  ;;  %v2967_v44 = vpop.eup %2966 }
 0x5df   :  { %1092 = vrot.lane.b32.xlu0 %v1089_v28, %s3133_s22  ;;  %1090 = vrot.lane.b32.xlu1 %v1089_v28, %s3134_s23 }
 0x5e1   :  { %v2969_v40 = vpop.eup %2968 }
 0x5e2   :  { %v1254_v45 = vsel %vm3322_vm4, %v2967_v44, %v2969_v40 }
 0x5e3   :  { %1257 = vrot.lane.b32.xlu0 %v1254_v45, %s3133_s22  ;;  %1255 = vrot.lane.b32.xlu1 %v1254_v45, %s3134_s23 }
 0x5e7   :  { %1259 = vrot.lane.b32.xlu0 %v1254_v45, %s3135_s11  ;;  %1094 = vrot.lane.b32.xlu1 %v1089_v28, %s3135_s11 }
 0x651   :  { %v1093_v46 = vpop.permute.xlu0 %1092  ;;  %v1091_v47 = vpop.permute.xlu1 %1090 }
 0x652   :  { %v1097_v29 = vmul.f32 %v1093_v46, %v1089_v28  ;;  %v1096_v48 = vmul.f32 %v1091_v47, %v3487_v62 }
 0x654   :  { %v3541_v49 = vadd.f32 %v1097_v29, %v1096_v48 }
 0x655   :  { %v1258_v56 = vpop.permute.xlu0 %1257  ;;  %v1256_v57 = vpop.permute.xlu1 %1255 }
 0x656   :  { %2970 = vtanh.f32 %v3541_v49  ;;  %v1262_v58 = vmul.f32 %v1258_v56, %v1254_v45  ;;  %v1261_v59 = vmul.f32 %v1256_v57, %v3491_v8 }
 0x658   :  { %v3545_v60 = vadd.f32 %v1262_v58, %v1261_v59 }
 0x659   :  { %v1095_v2 = vpop.permute.xlu1 %1094  ;;  %v1260_v62 = vpop.permute.xlu0 %1259 }
 0x65a   :  { %2972 = vtanh.f32 %v3545_v60 }
 0x663   :  { %v2971_v1 = vpop.eup %2970 }
 0x664   :  { %v1100_v3 = vmul.f32 %v2971_v1, %v1095_v2  ;;  %v286_v2 = vadd.f32 %v3407_v30, %v3303_v41 }
 0x666   :  { %2760 = vmatmul.mubr.msk.f32.vlgmr.msra.gmra.mxu0 %vm169_vm1, %v1100_v3 }
 0x667   :  { %v2973_v4 = vpop.eup %2972  ;;  %2774 = vmatpush3.msra.mxu0 %v3233_v9  ;;  %2781 = vmatprep.mubr.msk.f32.mxu0 %vm3132_vm0, %v3131_v7 }
 0x668   :  { %v1265_v11 = vmul.f32 %v2973_v4, %v1260_v62  ;;  %2775 = vmatprep.subr.mxu0 %v3131_v7 }
 0x669   :  { %2776 = vmatpush3.msra.mxu0 %v3239_v10 }
 0x66a   :  { %2777 = vmatprep.subr.mxu0 %v3131_v7  ;;  %2771 = vmatmul.mubr.msk.f32.vlgmr.msra.gmra.mxu1 %vm169_vm1, %v1265_v11 }
 0x66b   :  { %2778 = vmatpush3.msra.mxu0 %v3255_v14  ;;  %2785 = vmatpush3.msra.mxu1 %v3306_v50 }
 0x66c   :  { %2779 = vmatprep.subr.mxu0 %v3131_v7  ;;  %2786 = vmatprep.subr.mxu1 %v3131_v7 }
 0x66d   :  { %2780 = vmatpush3.msra.mxu0 %v3261_v15  ;;  %2787 = vmatpush3.msra.mxu1 %v3308_v51 }
 0x66e   :  { %2782 = vmatmul.mubr.msk.f32.vlgmr.msra.gmra.mxu0 %vm169_vm1, %v1265_v11  ;;  %2788 = vmatprep.subr.mxu1 %v3131_v7 }
 0x66f   :  { %2789 = vmatpush3.msra.mxu1 %v3314_v53  ;;  %2795 = vmatprep.subr.mxu0 %v3131_v7 }
 0x670   :  { %2790 = vmatprep.subr.mxu1 %v3131_v7  ;;  %2796 = vmatpush3.msra.mxu0 %v3311_v52 }
 0x671   :  { %2791 = vmatpush3.msra.mxu1 %v3320_v54  ;;  %2797 = vmatprep.subr.mxu0 %v3131_v7 }
 0x672   :  { %2792 = vmatprep.mubr.msk.f32.mxu1 %vm3132_vm0, %v3131_v7  ;;  %2798 = vmatpush3.msra.mxu0 %v3346_v61 }
 0x673   :  { %2806 = vmatprep.subr.mxu1 %v3131_v7  ;;  %2799 = vmatprep.subr.mxu0 %v3131_v7 }
 0x674   :  { %2800 = vmatpush3.msra.mxu0 %v3357_v63  ;;  %2803 = vmatprep.mubr.msk.f32.mxu0 %vm3132_vm0, %v3131_v7 }
 0x675   :  { %2801 = vmatprep.subr.mxu0 %v3131_v7 }
 0x676   :  { %2802 = vmatpush3.msra.mxu0 %v3362_v0 }
 0x677   :  { %2817 = vmatprep.subr.mxu0 %v3131_v7 }
 0x726   :  { %v1240_v8 = vpop.f32.mrf.mxu0 }
 0x727   :  { %v1241_v13 = vadd.f32 %v3414_v33, %v1240_v8 }
 0x728   :  { %v2761_v12 = vpop.f32.mrf.mxu0 }
 0x72a   :  { %v1335_v19 = vpop.f32.mrf.mxu1 }
 0x72b   :  { %v1336_v6 = vadd.f32 %v1335_v19, %v1241_v13 }
 0x72c   :  { %v2772_v20 = vpop.f32.mrf.mxu1 }
 0x72d   :  { %v2465_v21 = vmul.f32 -1.442695, %v1336_v6 }
 0x72e   :  { %v1424_v22 = vpop.f32.mrf.mxu0 }
 0x72f   :  { %2974 = vpow2.f32 %v2465_v21  ;;  %v1503_v23 = vadd.f32 %v1424_v22, %v281_v17 }
 0x730   :  { %v2783_v24 = vpop.f32.mrf.mxu0 }
 0x731   :  { %v2468_v5 = vmul.f32 -1.442695, %v1503_v23 }
 0x733   :  { %2976 = vpow2.f32 %v2468_v5 }
 0x734   :  { %2978 = vtanh.f32 %v1336_v6 }
 0x73c   :  { %v2975_v25 = vpop.eup %2974 }
 0x73d   :  { %v1343_v26 = vadd.f32 1.0, %v2975_v25 }
 0x73f   :  { %2980 = vrcp.f32 %v1343_v26 }
 0x740   :  { %v2977_v27 = vpop.eup %2976  ;;  %2982 = vtanh.f32 %v1503_v23 }
 0x741   :  { %v1508_v16 = vadd.f32 1.0, %v2977_v27  ;;  %v2979_v18 = vpop.eup %2978 }
 0x743   :  { %2984 = vrcp.f32 %v1508_v16 }
 0x74c   :  { %v2981_v31 = vpop.eup %2980 }
 0x74d   :  { %v1346_v34 = vsel %vm3322_vm4, %v2979_v18, %v2981_v31  ;;  %v2983_v32 = vpop.eup %2982 }
 0x74e   :  { %1349 = vrot.lane.b32.xlu0 %v1346_v34, %s3133_s22  ;;  %1347 = vrot.lane.b32.xlu1 %v1346_v34, %s3134_s23 }
 0x750   :  { %v2985_v35 = vpop.eup %2984 }
 0x751   :  { %v1511_v36 = vsel %vm3322_vm4, %v2983_v32, %v2985_v35 }
 0x752   :  { %1514 = vrot.lane.b32.xlu0 %v1511_v36, %s3133_s22  ;;  %1512 = vrot.lane.b32.xlu1 %v1511_v36, %s3134_s23 }
 0x756   :  { %1516 = vrot.lane.b32.xlu0 %v1511_v36, %s3135_s11  ;;  %1351 = vrot.lane.b32.xlu1 %v1346_v34, %s3135_s11 }
 0x7c0   :  { %v1350_v38 = vpop.permute.xlu0 %1349  ;;  %v1348_v42 = vpop.permute.xlu1 %1347 }
 0x7c1   :  { %v1354_v43 = vmul.f32 %v1350_v38, %v1346_v34  ;;  %v1353_v28 = vmul.f32 %v1348_v42, %v3541_v49 }
 0x7c3   :  { %v3595_v44 = vadd.f32 %v1354_v43, %v1353_v28  ;;  %v3660_v43 = vld [vmem:[%s3797_s4 + $0x18] sm:$0xff] }
 0x7c4   :  { %v1515_v40 = vpop.permute.xlu0 %1514  ;;  %v1513_v45 = vpop.permute.xlu1 %1512 }
 0x7c5   :  { %2986 = vtanh.f32 %v3595_v44  ;;  %v1519_v46 = vmul.f32 %v1515_v40, %v1511_v36  ;;  %v1518_v47 = vmul.f32 %v1513_v45, %v3545_v60  ;;  %v3677_v40 = vld [vmem:[%s3797_s4 + $0x8] sm:$0xff]  ;;  %v3686_v45 = vld [vmem:[%s3797_s4] sm:$0xff] }
 0x7c7   :  { %v3599_v29 = vadd.f32 %v1519_v46, %v1518_v47 }
 0x7c8   :  { %v1352_v56 = vpop.permute.xlu1 %1351  ;;  %v1517_v49 = vpop.permute.xlu0 %1516 }
 0x7c9   :  { %2988 = vtanh.f32 %v3599_v29 }
 0x7d2   :  { %v2987_v48 = vpop.eup %2986 }
 0x7d3   :  { %v1357_v57 = vmul.f32 %v2987_v48, %v1352_v56 }
 0x7d5   :  { %2793 = vmatmul.mubr.msk.f32.vlgmr.msra.gmra.mxu1 %vm169_vm1, %v1357_v57 }
 0x7d6   :  { %v2989_v58 = vpop.eup %2988  ;;  %2807 = vmatpush3.msra.mxu1 %v3233_v9  ;;  %2814 = vmatprep.mubr.msk.f32.mxu1 %vm3132_vm0, %v3131_v7 }
 0x7d7   :  { %v1522_v59 = vmul.f32 %v2989_v58, %v1517_v49  ;;  %2808 = vmatprep.subr.mxu1 %v3131_v7 }
 0x7d8   :  { %2809 = vmatpush3.msra.mxu1 %v3239_v10 }
 0x7d9   :  { %2810 = vmatprep.subr.mxu1 %v3131_v7  ;;  %2804 = vmatmul.mubr.msk.f32.vlgmr.msra.gmra.mxu0 %vm169_vm1, %v1522_v59 }
 0x7da   :  { %2811 = vmatpush3.msra.mxu1 %v3255_v14  ;;  %2818 = vmatpush3.msra.mxu0 %v3306_v50 }
 0x7db   :  { %2812 = vmatprep.subr.mxu1 %v3131_v7  ;;  %2819 = vmatprep.subr.mxu0 %v3131_v7 }
 0x7dc   :  { %2813 = vmatpush3.msra.mxu1 %v3261_v15  ;;  %2820 = vmatpush3.msra.mxu0 %v3308_v51 }
 0x7dd   :  { %2815 = vmatmul.mubr.msk.f32.vlgmr.msra.gmra.mxu1 %vm169_vm1, %v1522_v59  ;;  %2821 = vmatprep.subr.mxu0 %v3131_v7 }
 0x7de   :  { %2822 = vmatpush3.msra.mxu0 %v3314_v53  ;;  %2828 = vmatprep.subr.mxu1 %v3131_v7 }
 0x7df   :  { %2823 = vmatprep.subr.mxu0 %v3131_v7  ;;  %2829 = vmatpush3.msra.mxu1 %v3311_v52 }
 0x7e0   :  { %2824 = vmatpush3.msra.mxu0 %v3320_v54  ;;  %2830 = vmatprep.subr.mxu1 %v3131_v7 }
 0x7e1   :  { %2825 = vmatprep.mubr.msk.f32.mxu0 %vm3132_vm0, %v3131_v7  ;;  %2831 = vmatpush3.msra.mxu1 %v3346_v61 }
 0x7e2   :  { %2839 = vmatprep.subr.mxu0 %v3131_v7  ;;  %2832 = vmatprep.subr.mxu1 %v3131_v7 }
 0x7e3   :  { %2833 = vmatpush3.msra.mxu1 %v3357_v63  ;;  %2836 = vmatprep.mubr.msk.f32.mxu1 %vm3132_vm0, %v3131_v7 }
 0x7e4   :  { %2834 = vmatprep.subr.mxu1 %v3131_v7 }
 0x7e5   :  { %2835 = vmatpush3.msra.mxu1 %v3362_v0 }
 0x7e6   :  { %2850 = vmatprep.subr.mxu1 %v3131_v7 }
 0x895   :  { %v1497_v9 = vpop.f32.mrf.mxu1 }
 0x896   :  { %v1498_v14 = vadd.f32 %v3414_v33, %v1497_v9 }
 0x897   :  { %v2794_v10 = vpop.f32.mrf.mxu1 }
 0x899   :  { %v1592_v15 = vpop.f32.mrf.mxu0 }
 0x89a   :  { %v1593_v60 = vadd.f32 %v1592_v15, %v1498_v14 }
 0x89b   :  { %v2805_v1 = vpop.f32.mrf.mxu0 }
 0x89c   :  { %v2470_v3 = vmul.f32 -1.442695, %v1593_v60 }
 0x89d   :  { %v1681_v4 = vpop.f32.mrf.mxu1 }
 0x89e   :  { %2990 = vpow2.f32 %v2470_v3  ;;  %v1760_v62 = vadd.f32 %v1681_v4, %v286_v2 }
 0x89f   :  { %v2816_v11 = vpop.f32.mrf.mxu1 }
 0x8a0   :  { %v2473_v8 = vmul.f32 -1.442695, %v1760_v62 }
 0x8a2   :  { %2992 = vpow2.f32 %v2473_v8 }
 0x8a3   :  { %2994 = vtanh.f32 %v1593_v60 }
 0x8ab   :  { %v2991_v12 = vpop.eup %2990 }
 0x8ac   :  { %v1600_v13 = vadd.f32 1.0, %v2991_v12 }
 0x8ae   :  { %2996 = vrcp.f32 %v1600_v13 }
 0x8af   :  { %v2993_v19 = vpop.eup %2992  ;;  %2998 = vtanh.f32 %v1760_v62 }
 0x8b0   :  { %v1765_v6 = vadd.f32 1.0, %v2993_v19  ;;  %v2995_v20 = vpop.eup %2994 }
 0x8b2   :  { %3000 = vrcp.f32 %v1765_v6 }
 0x8bb   :  { %v2997_v17 = vpop.eup %2996 }
 0x8bc   :  { %v1603_v41 = vsel %vm3322_vm4, %v2995_v20, %v2997_v17  ;;  %v2999_v30 = vpop.eup %2998 }
 0x8bd   :  { %1606 = vrot.lane.b32.xlu0 %v1603_v41, %s3133_s22  ;;  %1604 = vrot.lane.b32.xlu1 %v1603_v41, %s3134_s23 }
 0x8bf   :  { %v3001_v21 = vpop.eup %3000 }
 0x8c0   :  { %v1768_v22 = vsel %vm3322_vm4, %v2999_v30, %v3001_v21 }
 0x8c1   :  { %1771 = vrot.lane.b32.xlu0 %v1768_v22, %s3133_s22  ;;  %1769 = vrot.lane.b32.xlu1 %v1768_v22, %s3134_s23 }
 0x8c5   :  { %1773 = vrot.lane.b32.xlu0 %v1768_v22, %s3135_s11  ;;  %1608 = vrot.lane.b32.xlu1 %v1603_v41, %s3135_s11 }
 0x92f   :  { %v1607_v23 = vpop.permute.xlu0 %1606  ;;  %v1605_v24 = vpop.permute.xlu1 %1604 }
 0x930   :  { %v1611_v5 = vmul.f32 %v1607_v23, %v1603_v41  ;;  %v1610_v25 = vmul.f32 %v1605_v24, %v3595_v44  ;;  %v3669_v44 = vld [vmem:[%s3797_s4 + $0x10] sm:$0xff] }
 0x931   :  { %v3052_v23 = vld [vmem:[#allocation7 + $0x10] sm:$0xff]  ;;  %v3053_v24 = vld [vmem:[#allocation7 + $0x8] sm:$0xff] }
 0x932   :  { %v3649_v26 = vadd.f32 %v1611_v5, %v1610_v25  ;;  %v3054_v5 = vld [vmem:[#allocation4 + $0x18] sm:$0xff]  ;;  %v3055_v25 = vld [vmem:[#allocation7] sm:$0xff] }
 0x933   :  { %v1772_v27 = vpop.permute.xlu0 %1771  ;;  %v1770_v16 = vpop.permute.xlu1 %1769 }
 0x934   :  { %3002 = vtanh.f32 %v3649_v26  ;;  %v1776_v18 = vmul.f32 %v1772_v27, %v1768_v22  ;;  %v1775_v31 = vmul.f32 %v1770_v16, %v3599_v29  ;;  %v3051_v22 = vld [vmem:[#allocation7 + $0x18] sm:$0xff]  ;;  %v3057_v27 = vld [vmem:[#allocation4 + $0x8] sm:$0xff]  ;;  %v3058_v16 = vld [vmem:[#allocation4] sm:$0xff] }
 0x936   :  { %v3653_v34 = vadd.f32 %v1776_v18, %v1775_v31 }
 0x937   :  { %v1609_v35 = vpop.permute.xlu1 %1608  ;;  %v1774_v42 = vpop.permute.xlu0 %1773 }
 0x938   :  { %3004 = vtanh.f32 %v3653_v34 }
 0x941   :  { %v3003_v32 = vpop.eup %3002 }
 0x942   :  { %v1614_v36 = vmul.f32 %v3003_v32, %v1609_v35 }
 0x944   :  { %2826 = vmatmul.mubr.msk.f32.vlgmr.msra.gmra.mxu0 %vm169_vm1, %v1614_v36 }
 0x945   :  { %v3005_v38 = vpop.eup %3004  ;;  %2840 = vmatpush3.msra.mxu0 %v3660_v43  ;;  %2847 = vmatprep.mubr.msk.f32.mxu0 %vm3132_vm0, %v3131_v7 }
 0x946   :  { %v1779_v28 = vmul.f32 %v3005_v38, %v1774_v42  ;;  %2841 = vmatprep.subr.mxu0 %v3131_v7 }
 0x947   :  { %2842 = vmatpush3.msra.mxu0 %v3669_v44 }
 0x948   :  { %2843 = vmatprep.subr.mxu0 %v3131_v7  ;;  %2837 = vmatmul.mubr.msk.f32.vlgmr.msra.gmra.mxu1 %vm169_vm1, %v1779_v28 }
 0x949   :  { %2844 = vmatpush3.msra.mxu0 %v3677_v40  ;;  %2851 = vmatpush3.msra.mxu1 %v3306_v50 }
 0x94a   :  { %2845 = vmatprep.subr.mxu0 %v3131_v7  ;;  %2852 = vmatprep.subr.mxu1 %v3131_v7 }
 0x94b   :  { %2846 = vmatpush3.msra.mxu0 %v3686_v45  ;;  %2853 = vmatpush3.msra.mxu1 %v3308_v51 }
 0x94c   :  { %2848 = vmatmul.mubr.msk.f32.vlgmr.msra.gmra.mxu0 %vm169_vm1, %v1779_v28  ;;  %2854 = vmatprep.subr.mxu1 %v3131_v7 }
 0x94d   :  { %2855 = vmatpush3.msra.mxu1 %v3314_v53  ;;  %2861 = vmatprep.subr.mxu0 %v3131_v7 }
 0x94e   :  { %2856 = vmatprep.subr.mxu1 %v3131_v7  ;;  %2862 = vmatpush3.msra.mxu0 %v3311_v52 }
 0x94f   :  { %2857 = vmatpush3.msra.mxu1 %v3320_v54  ;;  %2863 = vmatprep.subr.mxu0 %v3131_v7 }
 0x950   :  { %2858 = vmatprep.mubr.msk.f32.mxu1 %vm3132_vm0, %v3131_v7  ;;  %2864 = vmatpush3.msra.mxu0 %v3346_v61 }
 0x951   :  { %2872 = vmatprep.subr.mxu1 %v3131_v7  ;;  %2865 = vmatprep.subr.mxu0 %v3131_v7 }
 0x952   :  { %2866 = vmatpush3.msra.mxu0 %v3357_v63  ;;  %2869 = vmatprep.mubr.msk.f32.mxu0 %vm3132_vm0, %v3131_v7  ;;  %v3713_v63 = vld [vmem:[%s3798_s5] ss:$0 sm:$0xff] }
 0x953   :  { %2867 = vmatprep.subr.mxu0 %v3131_v7  ;;  %v291_v46 = vadd.f32 %v3713_v63, %v3421_v39  ;;  %v296_v38 = vadd.f32 %v3713_v63, %v3418_v37 }
 0x954   :  { %2868 = vmatpush3.msra.mxu0 %v3362_v0 }
 0x955   :  { %2883 = vmatprep.subr.mxu0 %v3131_v7 }
 0xa04   :  { %v1754_v50 = vpop.f32.mrf.mxu0 }
 0xa05   :  { %v1755_v52 = vadd.f32 %v3414_v33, %v1754_v50 }
 0xa06   :  { %v2827_v51 = vpop.f32.mrf.mxu0 }
 0xa08   :  { %v1849_v53 = vpop.f32.mrf.mxu1 }
 0xa09   :  { %v1850_v54 = vadd.f32 %v1849_v53, %v1755_v52 }
 0xa0a   :  { %v2838_v61 = vpop.f32.mrf.mxu1 }
 0xa0b   :  { %v2475_v47 = vmul.f32 -1.442695, %v1850_v54 }
 0xa0c   :  { %v1938_v29 = vpop.f32.mrf.mxu0 }
 0xa0d   :  { %3006 = vpow2.f32 %v2475_v47  ;;  %v2017_v0 = vadd.f32 %v1938_v29, %v291_v46 }
 0xa0e   :  { %v2849_v48 = vpop.f32.mrf.mxu0 }
 0xa0f   :  { %v2478_v56 = vmul.f32 -1.442695, %v2017_v0 }
 0xa11   :  { %3008 = vpow2.f32 %v2478_v56 }
 0xa12   :  { %3010 = vtanh.f32 %v1850_v54 }
 0xa1a   :  { %v3007_v57 = vpop.eup %3006 }
 0xa1b   :  { %v1857_v58 = vadd.f32 1.0, %v3007_v57 }
 0xa1d   :  { %3012 = vrcp.f32 %v1857_v58 }
 0xa1e   :  { %v3009_v49 = vpop.eup %3008  ;;  %3014 = vtanh.f32 %v2017_v0 }
 0xa1f   :  { %v2022_v59 = vadd.f32 1.0, %v3009_v49  ;;  %v3011_v9 = vpop.eup %3010 }
 0xa21   :  { %3016 = vrcp.f32 %v2022_v59 }
 0xa2a   :  { %v3013_v10 = vpop.eup %3012 }
 0xa2b   :  { %v1860_v39 = vsel %vm3322_vm4, %v3011_v9, %v3013_v10  ;;  %v3015_v14 = vpop.eup %3014 }
 0xa2c   :  { %1863 = vrot.lane.b32.xlu0 %v1860_v39, %s3133_s22  ;;  %1861 = vrot.lane.b32.xlu1 %v1860_v39, %s3134_s23 }
 0xa2e   :  { %v3017_v15 = vpop.eup %3016 }
 0xa2f   :  { %v2025_v60 = vsel %vm3322_vm4, %v3015_v14, %v3017_v15 }
 0xa30   :  { %2028 = vrot.lane.b32.xlu0 %v2025_v60, %s3133_s22  ;;  %2026 = vrot.lane.b32.xlu1 %v2025_v60, %s3134_s23 }
 0xa34   :  { %2030 = vrot.lane.b32.xlu0 %v2025_v60, %s3135_s11  ;;  %1865 = vrot.lane.b32.xlu1 %v1860_v39, %s3135_s11 }
 0xa9e   :  { %v1864_v1 = vpop.permute.xlu0 %1863  ;;  %v1862_v2 = vpop.permute.xlu1 %1861 }
 0xa9f   :  { %v1868_v3 = vmul.f32 %v1864_v1, %v1860_v39  ;;  %v1867_v4 = vmul.f32 %v1862_v2, %v3649_v26  ;;  %v3056_v26 = vld [vmem:[#allocation4 + $0x10] sm:$0xff]  ;;  %v3059_v2 = vld [vmem:[%s3801_s8] ss:$0 sm:$0xff] }
 0xaa1   :  { %v3728_v62 = vadd.f32 %v1868_v3, %v1867_v4 }
 0xaa2   :  { %v2029_v11 = vpop.permute.xlu0 %2028  ;;  %v2027_v8 = vpop.permute.xlu1 %2026 }
 0xaa3   :  { %3018 = vtanh.f32 %v3728_v62  ;;  %v2033_v12 = vmul.f32 %v2029_v11, %v2025_v60  ;;  %v2032_v13 = vmul.f32 %v2027_v8, %v3653_v34 }
 0xaa5   :  { %v3732_v19 = vadd.f32 %v2033_v12, %v2032_v13 }
 0xaa6   :  { %v1866_v20 = vpop.permute.xlu1 %1865  ;;  %v2031_v30 = vpop.permute.xlu0 %2030 }
 0xaa7   :  { %3020 = vtanh.f32 %v3732_v19 }
 0xab0   :  { %v3019_v6 = vpop.eup %3018 }
 0xab1   :  { %v1871_v17 = vmul.f32 %v3019_v6, %v1866_v20 }
 0xab3   :  { %2859 = vmatmul.mubr.msk.f32.vlgmr.msra.gmra.mxu1 %vm169_vm1, %v1871_v17 }
 0xab4   :  { %v3021_v41 = vpop.eup %3020  ;;  %2873 = vmatpush3.msra.mxu1 %v3660_v43  ;;  %2880 = vmatprep.mubr.msk.f32.mxu1 %vm3132_vm0, %v3131_v7 }
 0xab5   :  { %v2036_v21 = vmul.f32 %v3021_v41, %v2031_v30  ;;  %2874 = vmatprep.subr.mxu1 %v3131_v7 }
 0xab6   :  { %2875 = vmatpush3.msra.mxu1 %v3669_v44 }
 0xab7   :  { %2876 = vmatprep.subr.mxu1 %v3131_v7  ;;  %2870 = vmatmul.mubr.msk.f32.vlgmr.msra.gmra.mxu0 %vm169_vm1, %v2036_v21 }
 0xab8   :  { %2877 = vmatpush3.msra.mxu1 %v3677_v40  ;;  %2884 = vmatpush3.msra.mxu0 %v3051_v22 }
 0xab9   :  { %2878 = vmatprep.subr.mxu1 %v3131_v7  ;;  %2885 = vmatprep.subr.mxu0 %v3131_v7 }
 0xaba   :  { %2879 = vmatpush3.msra.mxu1 %v3686_v45  ;;  %2886 = vmatpush3.msra.mxu0 %v3052_v23 }
 0xabb   :  { %2881 = vmatmul.mubr.msk.f32.vlgmr.msra.gmra.mxu1 %vm169_vm1, %v2036_v21  ;;  %2887 = vmatprep.subr.mxu0 %v3131_v7 }
 0xabc   :  { %2894 = vmatprep.subr.mxu1 %v3131_v7  ;;  %2888 = vmatpush3.msra.mxu0 %v3053_v24  ;;  %v2486_v24 = vld [vmem:[%s3802_s9] ss:$0 sm:$0xff] }
 0xabd   :  { %2895 = vmatpush3.msra.mxu1 %v3054_v5  ;;  %2889 = vmatprep.subr.mxu0 %v3131_v7 }
 0xabe   :  { %2896 = vmatprep.subr.mxu1 %v3131_v7  ;;  %2890 = vmatpush3.msra.mxu0 %v3055_v25 }
 0xabf   :  { %2891 = vmatprep.mubr.msk.f32.mxu0 %vm3132_vm0, %v3131_v7  ;;  %2897 = vmatpush3.msra.mxu1 %v3056_v26 }
 0xac0   :  { %2898 = vmatprep.subr.mxu1 %v3131_v7  ;;  %2902 = vmatprep.mubr.msk.f32.mxu1 %vm3132_vm0, %v3131_v7 }
 0xac1   :  { %2899 = vmatpush3.msra.mxu1 %v3057_v27 }
 0xac2   :  { %2900 = vmatprep.subr.mxu1 %v3131_v7 }
 0xac3   :  { %2901 = vmatpush3.msra.mxu1 %v3058_v16 }
 0xb73   :  { %v2011_v18 = vpop.f32.mrf.mxu1 }
 0xb74   :  { %v2012_v34 = vadd.f32 %v3414_v33, %v2011_v18 }
 0xb75   :  { %v2860_v31 = vpop.f32.mrf.mxu1 }
 0xb76   :  { %v2488_v31 = vld [vmem:[#allocation3] ss:$0 sm:$0xff] }
 0xb77   :  { %v2106_v32 = vpop.f32.mrf.mxu0 }
 0xb78   :  { %v2107_v35 = vadd.f32 %v2106_v32, %v2012_v34 }
 0xb79   :  { %v2871_v36 = vpop.f32.mrf.mxu0 }
 0xb7a   :  { %v2480_v42 = vmul.f32 -1.442695, %v2107_v35 }
 0xb7b   :  { %v2195_v43 = vpop.f32.mrf.mxu1 }
 0xb7c   :  { %3022 = vpow2.f32 %v2480_v42  ;;  %v2274_v28 = vadd.f32 %v2195_v43, %v296_v38 }
 0xb7d   :  { %v2882_v44 = vpop.f32.mrf.mxu1 }
 0xb7e   :  { %v2483_v40 = vmul.f32 -1.442695, %v2274_v28 }
 0xb80   :  { %3024 = vpow2.f32 %v2483_v40 }
 0xb81   :  { %3026 = vtanh.f32 %v2107_v35 }
 0xb89   :  { %v3023_v7 = vpop.eup %3022 }
 0xb8a   :  { %v2114_v45 = vadd.f32 1.0, %v3023_v7 }
 0xb8c   :  { %3028 = vrcp.f32 %v2114_v45 }
 0xb8d   :  { %v3025_v50 = vpop.eup %3024  ;;  %3030 = vtanh.f32 %v2274_v28 }
 0xb8e   :  { %v2279_v51 = vadd.f32 1.0, %v3025_v50  ;;  %v3027_v33 = vpop.eup %3026 }
 0xb90   :  { %3032 = vrcp.f32 %v2279_v51 }
 0xb99   :  { %v3029_v52 = vpop.eup %3028 }
 0xb9a   :  { %v2117_v37 = vsel %vm3322_vm4, %v3027_v33, %v3029_v52  ;;  %v3031_v53 = vpop.eup %3030 }
 0xb9b   :  { %2120 = vrot.lane.b32.xlu0 %v2117_v37, %s3133_s22  ;;  %2118 = vrot.lane.b32.xlu1 %v2117_v37, %s3134_s23 }
 0xb9d   :  { %v3033_v54 = vpop.eup %3032 }
 0xb9e   :  { %v2282_v61 = vsel %vm3322_vm4, %v3031_v53, %v3033_v54 }
 0xb9f   :  { %2285 = vrot.lane.b32.xlu0 %v2282_v61, %s3133_s22  ;;  %2283 = vrot.lane.b32.xlu1 %v2282_v61, %s3134_s23 }
 0xba3   :  { %2287 = vrot.lane.b32.xlu0 %v2282_v61, %s3135_s11  ;;  %2122 = vrot.lane.b32.xlu1 %v2117_v37, %s3135_s11 }
 0xc0d   :  { %v2121_v63 = vpop.permute.xlu0 %2120  ;;  %v2119_v46 = vpop.permute.xlu1 %2118 }
 0xc0e   :  { %v2125_v47 = vmul.f32 %v2121_v63, %v2117_v37  ;;  %v2124_v29 = vmul.f32 %v2119_v46, %v3728_v62 }
 0xc10   :  { %v2126_v0 = vadd.f32 %v2125_v47, %v2124_v29 }
 0xc11   :  { %v2286_v48 = vpop.permute.xlu0 %2285  ;;  %v2284_v56 = vpop.permute.xlu1 %2283 }
 0xc12   :  { %3034 = vtanh.f32 %v2126_v0  ;;  %v2290_v57 = vmul.f32 %v2286_v48, %v2282_v61  ;;  %v2289_v58 = vmul.f32 %v2284_v56, %v3732_v19 }
 0xc14   :  { %v2291_v49 = vadd.f32 %v2290_v57, %v2289_v58 }
 0xc15   :  { %v2123_v9 = vpop.permute.xlu1 %2122  ;;  %v2288_v14 = vpop.permute.xlu0 %2287 }
 0xc16   :  { %3036 = vtanh.f32 %v2291_v49 }
 0xc1f   :  { %v3035_v59 = vpop.eup %3034 }
 0xc20   :  { %v2128_v10 = vmul.f32 %v3035_v59, %v2123_v9 }
 0xc22   :  { %2892 = vmatmul.mubr.msk.f32.vlgmr.msra.gmra.mxu0 %vm169_vm1, %v2128_v10 }
 0xc23   :  { %v3037_v39 = vpop.eup %3036 }
 0xc24   :  { %v2293_v15 = vmul.f32 %v3037_v39, %v2288_v14 }
 0xc26   :  { %2903 = vmatmul.mubr.msk.f32.vlgmr.msra.gmra.mxu1 %vm169_vm1, %v2293_v15  ;;  %v2393_v26 = vmul.f32 %v2486_v24, %v2293_v15 }
 0xce2   :  { %v2268_v60 = vpop.f32.mrf.mxu0 }
 0xce3   :  { %v2269_v3 = vadd.f32 %v3059_v2, %v2268_v60 }
 0xce4   :  { %v2893_v1 = vpop.f32.mrf.mxu0 }
 0xce6   :  { %v2363_v4 = vpop.f32.mrf.mxu1 }
 0xce7   :  { %v2364_v62 = vadd.f32 %v2363_v4, %v2269_v3 }
 0xce8   :  { %v2904_v11 = vpop.f32.mrf.mxu1 }
 0xce9   :  { %v2485_v8 = vmul.f32 -1.442695, %v2364_v62 }
 0xceb   :  { %3038 = vpow2.f32 %v2485_v8 }
 0xcec   :  { %3040 = vtanh.f32 %v2364_v62 }
 0xcf8   :  { %v3039_v12 = vpop.eup %3038 }
 0xcf9   :  { %v2371_v13 = vadd.f32 1.0, %v3039_v12  ;;  %v3041_v19 = vpop.eup %3040 }
 0xcfb   :  { %3042 = vrcp.f32 %v2371_v13 }
 0xd08   :  { %v3043_v6 = vpop.eup %3042 }
 0xd09   :  { %v2374_v20 = vsel %vm3322_vm4, %v3041_v19, %v3043_v6 }
 0xd0a   :  { %2377 = vrot.lane.b32.xlu0 %v2374_v20, %s3133_s22  ;;  %2375 = vrot.lane.b32.xlu1 %v2374_v20, %s3134_s23  ;;  %s2426_s22 = sshll.u32 %s3136_s2, 4  ;;  %s2427_s22 = int_to_ptr.vmem [resolvable:$true] %s2426_s22 }
 0xd0b   :  { %s3100_s9 = scalar_lea.vmem %s2427_s22, 128  ;;  %p3105_p11 = scmp.lt.s32.totalorder %s2427_s22, %s2427_s22 }
 0xd0c   :  { %p3101_p10 = scmp.ne.s32.totalorder %s2427_s22, %s3100_s9  ;;  %p3106_p12 = scmp.lt.s32.totalorder %s3100_s9, %s3100_s9 }
 0xd0e   :  { %2379 = vrot.lane.b32.xlu1 %v2374_v20, %s3135_s11  ;;  %p3107_p13 = por %p3106_p12, %p3105_p11 }
 0xd10   :  { %p3108_p0 = pnand %p3107_p13, %p3101_p10 }
 0xd7c   :  { %v2378_v17 = vpop.permute.xlu0 %2377  ;;  %v2376_v41 = vpop.permute.xlu1 %2375 }
 0xd7d   :  { %v2382_v30 = vmul.f32 %v2378_v17, %v2374_v20  ;;  %v2381_v21 = vmul.f32 %v2376_v41, %v2126_v0 }
 0xd7f   :  { %v2383_v22 = vadd.f32 %v2382_v30, %v2381_v21 }
 0xd80   :  { %v2380_v5 = vpop.permute.xlu1 %2379 }
 0xd81   :  { %3044 = vtanh.f32 %v2383_v22 }
 0xd8e   :  { %v3045_v23 = vpop.eup %3044 }
 0xd8f   :  { %v2385_v25 = vmul.f32 %v3045_v23, %v2380_v5 }
 0xd91   :  { %v2401_v27 = vmul.f32 %v2487_v55, %v2385_v25 }
 0xd93   :  { %v2402_v16 = vadd.f32 %v2401_v27, %v2393_v26 }
 0xd95   :  { %v2403_v18 = vsel %vm169_vm1, %v2402_v16, 0.0 }
 0xd96   :  { %2404 = vadd.xlane.f32.xlu0 %v2403_v18 }
 0xe1f   :  { %v2405_v34 = vpop.xlane.xlu0 %2404 }
 0xe20   :  { %v2413_v32 = vadd.f32 %v2488_v31, %v2405_v34 }
 0xe22   :  { %2416 = vperm.xlu1 %2917, %v2413_v32  }
 0xe9d   :  { %v2417_v35 = vpop.permute.xlu1 %2416 }
 0xe9e   :  { %2419 = vst [vmem:[#allocation9] sm:$0xff] %v2417_v35 }
 0xe9f   :  { %3111 = shalt.err (!%p3108_p0)
}
 0xea0   :  { %2429 = dma.vmem_to_hbm [thread:$0]  %s2427_s22, 128, %s3805_s12, [#allocation6]  }
 0xea1   :  { %3124 = dma.done.wait [#allocation6], 128  }
 0xea2   :  { %3125 = vsyncadd [#allocation6], 4294967168 }
 0xea3   :  { %2433 = vsyncpa [#allocation5], 1 }
 0xea4   :  { %2434 = vsyncpa [#allocation8], 1 }
 0xea5   :  { %2435 = vsyncpa [#allocation6], 1 }

</bundles_post_ra>
